<compile_context>
chip_gen: v6e
topology: v6e:2x2x1
jax: 0.10.0
libtpu: 0.0.40
codegen_flags: <defaults>
</compile_context>

<pallas_src>
import functools
import math

import jax
import jax.numpy as jnp
from jax.experimental import pallas as pl
from jax.experimental.pallas import tpu as pltpu

_LN_EPS = 1e-12


@functools.lru_cache(maxsize=None)
def _vmem_limit_bytes():
    """Generation-aware VMEM limit: ~75% of physical capacity."""
    try:
        cap = pltpu.get_tpu_info().vmem_capacity_bytes
        return int(cap * 3 // 4)
    except Exception:
        return 48 * 1024 * 1024  # conservative fallback (fits v7x 64 MiB/TC)


def _resident(shape, single_buffer):
    """BlockSpec for an operand fully resident in VMEM across the grid.

    Constant index_map => single-buffer it (no benefit from double buffering),
    freeing VMEM headroom on v7x.
    """
    n = len(shape)
    idx = lambda *_: (0,) * n
    if single_buffer:
        return pl.BlockSpec(shape, idx, pipeline_mode=pl.Buffered(1))
    return pl.BlockSpec(shape, idx)


def _layernorm_f32(x, g, b, eps):
    mu = jnp.mean(x, axis=-1, keepdims=True)
    var = jnp.mean((x - mu) ** 2, axis=-1, keepdims=True)
    return (x - mu) * jax.lax.rsqrt(var + eps) * g + b


# ---------------------------------------------------------------------------
# Fused BertLayer kernel: one grid step == one batch element (full sequence).
#   attention (fused qkv proj -> softmax -> ctx -> out dense -> add&LN)
#   then FFN (dense -> GELU -> dense -> add&LN) on the same resident tile.
# ---------------------------------------------------------------------------
def _layer_kernel(h_ref, wqkv_ref, bqkv_ref, wo_ref, bo_ref, ln1g_ref, ln1b_ref,
                  wi_ref, bi_ref, w2_ref, b2_ref, ln2g_ref, ln2b_ref, out_ref,
                  *, num_heads, head_dim, ln_eps, q_chunk):
    hb = h_ref[0]                                            # [S, H] bf16 (single read)
    S, H = hb.shape

    # --- BertSelfAttention: fused q|k|v projection (one MXU matmul) --------
    qkv = (jnp.dot(hb, wqkv_ref[...], preferred_element_type=jnp.float32)
           + bqkv_ref[...])                                  # [S, 3H] f32
    scale = 1.0 / math.sqrt(head_dim)
    q = qkv[:, :H] * scale                                   # fold 1/sqrt(d) into q
    k = qkv[:, H:2 * H]
    v = qkv[:, 2 * H:]

    def split_heads(t):                                      # [S, H] -> [nh, S, d]
        # TODO(synk): pltpu.einshape could avoid materializing this relayout;
        # kept as reshape+transpose for guaranteed lowering.
        return jnp.transpose(
            t.reshape(S, num_heads, head_dim), (1, 0, 2)).astype(jnp.bfloat16)

    qh, kh, vh = split_heads(q), split_heads(k), split_heads(v)

    # Query-chunked softmax: peak working set nh*q_chunk*S instead of nh*S^2.
    ctx_chunks = []
    for q0 in range(0, S, q_chunk):
        qc = qh[:, q0:q0 + q_chunk, :]                       # [nh, qc, d]
        s = jnp.einsum('hqd,hkd->hqk', qc, kh,
                       preferred_element_type=jnp.float32)   # [nh, qc, S]
        s = s - jnp.max(s, axis=-1, keepdims=True)
        e = jnp.exp(s)
        p = (e / jnp.sum(e, axis=-1, keepdims=True)).astype(jnp.bfloat16)
        c = jnp.einsum('hqk,hkd->hqd', p, vh,
                       preferred_element_type=jnp.float32)   # [nh, qc, d]
        ctx_chunks.append(jnp.transpose(c, (1, 0, 2)).reshape(-1, H))
    ctx = ctx_chunks[0] if len(ctx_chunks) == 1 else jnp.concatenate(ctx_chunks, 0)

    # --- BertSelfOutput: dense + residual + LayerNorm (dropout = identity) -
    attn = (jnp.dot(ctx.astype(jnp.bfloat16), wo_ref[...],
                    preferred_element_type=jnp.float32) + bo_ref[...])
    y1 = _layernorm_f32(attn + hb.astype(jnp.float32),
                        ln1g_ref[...], ln1b_ref[...], ln_eps)

    # --- BertIntermediate + BertOutput (FFN), fused in the same program ----
    inter = (jnp.dot(y1.astype(jnp.bfloat16), wi_ref[...],
                     preferred_element_type=jnp.float32) + bi_ref[...])
    # TODO(synk): HF "gelu" is the exact erf form; tanh approximation is used
    # because erf lowering in Mosaic is not guaranteed.
    inter = jax.nn.gelu(inter, approximate=True)
    ff = (jnp.dot(inter.astype(jnp.bfloat16), w2_ref[...],
                  preferred_element_type=jnp.float32) + b2_ref[...])
    y2 = _layernorm_f32(ff + y1, ln2g_ref[...], ln2b_ref[...], ln_eps)
    out_ref[0] = y2.astype(out_ref.dtype)


def bert_layer_pallas(h, p, *, num_heads, ln_eps=_LN_EPS,
                      single_buffer_weights=True):
    B, S, H = h.shape
    head_dim = H // num_heads
    q_chunk = S if S <= 128 else 128
    args = (h, p['wqkv'], p['bqkv'], p['wo'], p['bo'], p['ln1_g'], p['ln1_b'],
            p['wi'], p['bi'], p['w2'], p['b2'], p['ln2_g'], p['ln2_b'])
    in_specs = [pl.BlockSpec((1, S, H), lambda b: (b, 0, 0))]
    in_specs += [_resident(a.shape, single_buffer_weights) for a in args[1:]]
    kernel = functools.partial(_layer_kernel, num_heads=num_heads,
                               head_dim=head_dim, ln_eps=ln_eps, q_chunk=q_chunk)
    # TODO(synk): for v7x small-batch inference a second parallel grid axis
    # (head groups / q-row blocks) would let both TensorCores work when B==1.
    return pl.pallas_call(
        kernel,
        grid=(B,),
        out_shape=jax.ShapeDtypeStruct((B, S, H), jnp.bfloat16),
        in_specs=in_specs,
        out_specs=pl.BlockSpec((1, S, H), lambda b: (b, 0, 0)),
        compiler_params=pltpu.CompilerParams(
            dimension_semantics=("parallel",),
            vmem_limit_bytes=_vmem_limit_bytes()),
    )(*args)


# ---------------------------------------------------------------------------
# Encoder: lax.scan over stacked layer params (is_eval=False path).
# ---------------------------------------------------------------------------
def bert_pcee_encoder_forward(hidden_states, stacked_params, *, num_heads,
                              ln_eps=_LN_EPS, single_buffer_weights=True):
    """Runs every layer, collecting per-layer [CLS] classifier logits
    (self.pcee_preds). Returns (last_hidden_state [B,S,H] bf16,
    pcee_preds [L,B,num_labels] f32)."""
    h0 = hidden_states.astype(jnp.bfloat16)  # bf16 inter-layer carry

    def body(h, p):
        y = bert_layer_pallas(h, p, num_heads=num_heads, ln_eps=ln_eps,
                              single_buffer_weights=single_buffer_weights)
        # PCEE classifier on [CLS] done wrapper-side (tiny matmul; avoids a
        # sub-128-lane masked store inside the kernel).
        cls = y[:, 0, :].astype(jnp.float32)
        logits = cls @ p['wc'].T + p['bc']
        return y, logits

    # TODO(synk): is_eval=True early-exit (patience / confidence_threshold with
    # .item() and a Python `break`) is data-dependent host control flow with no
    # clean Pallas/JAX equivalent; only the is_eval=False path is implemented.
    last_hidden, pcee_preds = jax.lax.scan(body, h0, stacked_params)
    return last_hidden, pcee_preds


# ---------------------------------------------------------------------------
# Pure-JAX reference (for numerical validation of the kernel).
# ---------------------------------------------------------------------------
def _reference_forward(hidden_states, stacked_params, *, num_heads,
                       ln_eps=_LN_EPS):
    B, S, H = hidden_states.shape
    d = H // num_heads
    h0 = hidden_states.astype(jnp.float32)

    def ln(x, g, b):
        mu = jnp.mean(x, -1, keepdims=True)
        var = jnp.mean((x - mu) ** 2, -1, keepdims=True)
        return (x - mu) * jax.lax.rsqrt(var + ln_eps) * g + b

    def body(h, p):
        qkv = h @ p['wqkv'].astype(jnp.float32) + p['bqkv']
        q, k, v = qkv[..., :H], qkv[..., H:2 * H], qkv[..., 2 * H:]
        sh = lambda t: jnp.transpose(t.reshape(B, S, num_heads, d), (0, 2, 1, 3))
        qh, kh, vh = sh(q), sh(k), sh(v)
        s = jnp.einsum('bhqd,bhkd->bhqk', qh, kh) / math.sqrt(d)
        probs = jax.nn.softmax(s, axis=-1)
        ctx = jnp.einsum('bhqk,bhkd->bhqd', probs, vh)
        ctx = jnp.transpose(ctx, (0, 2, 1, 3)).reshape(B, S, H)
        attn = ctx @ p['wo'].astype(jnp.float32) + p['bo']
        y1 = ln(attn + h, p['ln1_g'], p['ln1_b'])
        inter = jax.nn.gelu(y1 @ p['wi'].astype(jnp.float32) + p['bi'],
                            approximate=True)
        ff = inter @ p['w2'].astype(jnp.float32) + p['b2']
        y2 = ln(ff + y1, p['ln2_g'], p['ln2_b'])
        logits = y2[:, 0, :] @ p['wc'].T + p['bc']
        return y2, logits

    return jax.lax.scan(body, h0, stacked_params)


# ---------------------------------------------------------------------------
# Parameter construction.
# ---------------------------------------------------------------------------
def init_layer_params(key, hidden, intermediate, num_labels):
    ks = jax.random.split(key, 5)
    std = 0.02

    def wt(k, fan_in, fan_out):
        # Stored pre-transposed [in, out] in bf16 so kernels compute x @ W
        # directly (no in-kernel transpose; half the weight DMA bytes).
        return (std * jax.random.normal(k, (fan_in, fan_out))).astype(jnp.bfloat16)

    return {
        # q|k|v fused into a single pre-transposed [H, 3H] weight.
        'wqkv': wt(ks[0], hidden, 3 * hidden),
        'bqkv': jnp.zeros((1, 3 * hidden), jnp.float32),
        'wo': wt(ks[1], hidden, hidden),
        'bo': jnp.zeros((1, hidden), jnp.float32),
        'ln1_g': jnp.ones((1, hidden), jnp.float32),
        'ln1_b': jnp.zeros((1, hidden), jnp.float32),
        'wi': wt(ks[2], hidden, intermediate),
        'bi': jnp.zeros((1, intermediate), jnp.float32),
        'w2': wt(ks[3], intermediate, hidden),
        'b2': jnp.zeros((1, hidden), jnp.float32),
        'ln2_g': jnp.ones((1, hidden), jnp.float32),
        'ln2_b': jnp.zeros((1, hidden), jnp.float32),
        # PCEE classifier kept PyTorch-style [num_labels, hidden] (wrapper-side).
        'wc': (std * jax.random.normal(ks[4], (num_labels, hidden))).astype(jnp.float32),
        'bc': jnp.zeros((num_labels,), jnp.float32),
    }


def stack_layer_params(layer_params):
    return jax.tree_util.tree_map(lambda *xs: jnp.stack(xs), *layer_params)


if __name__ == "__main__":
    # Small config consistent with the module.
    B, S = 2, 8
    hidden_size = 32
    num_heads = 4
    intermediate_size = 64
    num_hidden_layers = 3
    num_labels = 2

    key = jax.random.PRNGKey(0)
    k_in, k_params = jax.random.split(key)
    hidden_states = jax.random.normal(k_in, (B, S, hidden_size), jnp.float32)

    layer_keys = jax.random.split(k_params, num_hidden_layers)
    layer_params = [
        init_layer_params(layer_keys[i], hidden_size, intermediate_size, num_labels)
        for i in range(num_hidden_layers)
    ]
    stacked = stack_layer_params(layer_params)

    def run(single_buffer):
        fwd = jax.jit(functools.partial(
            bert_pcee_encoder_forward, num_heads=num_heads,
            single_buffer_weights=single_buffer))
        out = fwd(hidden_states, stacked)
        jax.block_until_ready(out)
        return out

    try:
        last_hidden, pcee_preds = run(True)
    except Exception:
        # Fallback if single-buffered (pl.Buffered(1)) resident specs are not
        # supported by this jax / libtpu version.
        last_hidden, pcee_preds = run(False)

    assert last_hidden.shape == (B, S, hidden_size)
    assert pcee_preds.shape == (num_hidden_layers, B, num_labels)
    assert bool(jnp.all(jnp.isfinite(last_hidden.astype(jnp.float32))))
    assert bool(jnp.all(jnp.isfinite(pcee_preds)))

    # Numerical check against a pure-JAX reference (bf16 carry => loose tol).
    ref_hidden, ref_preds = jax.jit(functools.partial(
        _reference_forward, num_heads=num_heads))(hidden_states, stacked)
    assert jnp.allclose(last_hidden.astype(jnp.float32), ref_hidden,
                        atol=1e-1, rtol=1e-1)
    assert jnp.allclose(pcee_preds, ref_preds, atol=1e-1, rtol=1e-1)

    print("KERNEL_OK")
</pallas_src>

<mosaic_0001>
module attributes {stable_mosaic.version = 11 : i64} {
  func.func @_layer_kernel(%arg0: i32, %arg1: memref<1x8x32xbf16, #tpu.memory_space<vmem>>, %arg2: memref<32x96xbf16, #tpu.memory_space<vmem>>, %arg3: memref<1x96xf32, #tpu.memory_space<vmem>>, %arg4: memref<32x32xbf16, #tpu.memory_space<vmem>>, %arg5: memref<1x32xf32, #tpu.memory_space<vmem>>, %arg6: memref<1x32xf32, #tpu.memory_space<vmem>>, %arg7: memref<1x32xf32, #tpu.memory_space<vmem>>, %arg8: memref<32x64xbf16, #tpu.memory_space<vmem>>, %arg9: memref<1x64xf32, #tpu.memory_space<vmem>>, %arg10: memref<64x32xbf16, #tpu.memory_space<vmem>>, %arg11: memref<1x32xf32, #tpu.memory_space<vmem>>, %arg12: memref<1x32xf32, #tpu.memory_space<vmem>>, %arg13: memref<1x32xf32, #tpu.memory_space<vmem>>, %arg14: memref<1x8x32xbf16, #tpu.memory_space<vmem>>) attributes {dimension_semantics = [#tpu.dimension_semantics<parallel>], iteration_bounds = array<i64: 2>, scalar_prefetch = 0 : i64, scratch_operands = 0 : i64, tpu.core_type = #tpu.core_type<tc>, window_params = [{transform_indices = @transform_0, window_bounds = array<i64: 1, 8, 32>}, {pipeline_mode = #tpu.pipeline_mode<synchronous>, transform_indices = @transform_1, window_bounds = array<i64: 32, 96>}, {pipeline_mode = #tpu.pipeline_mode<synchronous>, transform_indices = @transform_2, window_bounds = array<i64: 1, 96>}, {pipeline_mode = #tpu.pipeline_mode<synchronous>, transform_indices = @transform_3, window_bounds = array<i64: 32, 32>}, {pipeline_mode = #tpu.pipeline_mode<synchronous>, transform_indices = @transform_4, window_bounds = array<i64: 1, 32>}, {pipeline_mode = #tpu.pipeline_mode<synchronous>, transform_indices = @transform_5, window_bounds = array<i64: 1, 32>}, {pipeline_mode = #tpu.pipeline_mode<synchronous>, transform_indices = @transform_6, window_bounds = array<i64: 1, 32>}, {pipeline_mode = #tpu.pipeline_mode<synchronous>, transform_indices = @transform_7, window_bounds = array<i64: 32, 64>}, {pipeline_mode = #tpu.pipeline_mode<synchronous>, transform_indices = @transform_8, window_bounds = array<i64: 1, 64>}, {pipeline_mode = #tpu.pipeline_mode<synchronous>, transform_indices = @transform_9, window_bounds = array<i64: 64, 32>}, {pipeline_mode = #tpu.pipeline_mode<synchronous>, transform_indices = @transform_10, window_bounds = array<i64: 1, 32>}, {pipeline_mode = #tpu.pipeline_mode<synchronous>, transform_indices = @transform_11, window_bounds = array<i64: 1, 32>}, {pipeline_mode = #tpu.pipeline_mode<synchronous>, transform_indices = @transform_12, window_bounds = array<i64: 1, 32>}, {transform_indices = @transform_13, window_bounds = array<i64: 1, 8, 32>}]} {
    %c0 = arith.constant 0 : index
    %c0_0 = arith.constant 0 : index
    %c0_1 = arith.constant 0 : index
    %0 = vector.load %arg1[%c0, %c0_0, %c0_1] : memref<1x8x32xbf16, #tpu.memory_space<vmem>>, vector<1x8x32xbf16>
    %1 = vector.shape_cast %0 : vector<1x8x32xbf16> to vector<8x32xbf16>
    %c0_2 = arith.constant 0 : index
    %c0_3 = arith.constant 0 : index
    %2 = vector.load %arg2[%c0_2, %c0_3] : memref<32x96xbf16, #tpu.memory_space<vmem>>, vector<32x96xbf16>
    %cst = arith.constant dense<0.000000e+00> : vector<8x96xf32>
    %3 = tpu.matmul %1, %2, %cst {dimension_numbers = #tpu.dot_dimension_numbers<[1], [0], [0], [1], [0, 0, 1, 1], [], []>} : vector<8x32xbf16>, vector<32x96xbf16>, vector<8x96xf32> -> vector<8x96xf32>
    %c0_4 = arith.constant 0 : index
    %c0_5 = arith.constant 0 : index
    %4 = vector.load %arg3[%c0_4, %c0_5] : memref<1x96xf32, #tpu.memory_space<vmem>>, vector<1x96xf32>
    %5 = vector.broadcast %4 : vector<1x96xf32> to vector<8x96xf32>
    %6 = arith.addf %3, %5 : vector<8x96xf32>
    %7 = vector.extract_strided_slice %6 {offsets = [0, 0], sizes = [8, 32], strides = [1, 1]} : vector<8x96xf32> to vector<8x32xf32>
    %cst_6 = arith.constant 0.353553385 : f32
    %8 = vector.broadcast %cst_6 : f32 to vector<8x32xf32>
    %9 = arith.mulf %7, %8 : vector<8x32xf32>
    %10 = vector.extract_strided_slice %6 {offsets = [0, 32], sizes = [8, 32], strides = [1, 1]} : vector<8x96xf32> to vector<8x32xf32>
    %11 = vector.extract_strided_slice %6 {offsets = [0, 64], sizes = [8, 32], strides = [1, 1]} : vector<8x96xf32> to vector<8x32xf32>
    %12 = vector.shape_cast %9 : vector<8x32xf32> to vector<8x4x8xf32>
    %13 = tpu.transpose %12, [1, 0, 2] : vector<8x4x8xf32> -> vector<4x8x8xf32>
    %14 = arith.truncf %13 : vector<4x8x8xf32> to vector<4x8x8xbf16>
    %15 = vector.shape_cast %10 : vector<8x32xf32> to vector<8x4x8xf32>
    %16 = tpu.transpose %15, [1, 0, 2] : vector<8x4x8xf32> -> vector<4x8x8xf32>
    %17 = arith.truncf %16 : vector<4x8x8xf32> to vector<4x8x8xbf16>
    %18 = vector.shape_cast %11 : vector<8x32xf32> to vector<8x4x8xf32>
    %19 = tpu.transpose %18, [1, 0, 2] : vector<8x4x8xf32> -> vector<4x8x8xf32>
    %20 = arith.truncf %19 : vector<4x8x8xf32> to vector<4x8x8xbf16>
    "tpu.trace_start"() <{level = 10 : i32, message = "hqd,hkd->hqk"}> : () -> ()
    %cst_7 = arith.constant dense<0.000000e+00> : vector<4x8x8xf32>
    %21 = tpu.matmul %14, %17, %cst_7 {dimension_numbers = #tpu.dot_dimension_numbers<[2], [2], [1], [1], [0, 0, 0, 1, 1, 1], [0], [0]>} : vector<4x8x8xbf16>, vector<4x8x8xbf16>, vector<4x8x8xf32> -> vector<4x8x8xf32>
    "tpu.trace_stop"() : () -> ()
    %cst_8 = arith.constant dense<0xFF800000> : vector<4x8xf32>
    %22 = vector.multi_reduction <maximumf>, %21, %cst_8 [2] : vector<4x8x8xf32> to vector<4x8xf32>
    %23 = vector.shape_cast %22 : vector<4x8xf32> to vector<4x8x1xf32>
    %24 = vector.broadcast %23 : vector<4x8x1xf32> to vector<4x8x8xf32>
    %25 = arith.subf %21, %24 : vector<4x8x8xf32>
    %26 = math.exp %25 : vector<4x8x8xf32>
    %cst_9 = arith.constant dense<0.000000e+00> : vector<4x8xf32>
    %27 = vector.multi_reduction <add>, %26, %cst_9 [2] : vector<4x8x8xf32> to vector<4x8xf32>
    %28 = vector.shape_cast %27 : vector<4x8xf32> to vector<4x8x1xf32>
    %29 = vector.broadcast %28 : vector<4x8x1xf32> to vector<4x8x8xf32>
    %30 = arith.divf %26, %29 : vector<4x8x8xf32>
    %31 = arith.truncf %30 : vector<4x8x8xf32> to vector<4x8x8xbf16>
    "tpu.trace_start"() <{level = 10 : i32, message = "hqk,hkd->hqd"}> : () -> ()
    %cst_10 = arith.constant dense<0.000000e+00> : vector<4x8x8xf32>
    %32 = tpu.matmul %31, %20, %cst_10 {dimension_numbers = #tpu.dot_dimension_numbers<[2], [1], [1], [2], [0, 0, 0, 1, 1, 2], [0], [0]>} : vector<4x8x8xbf16>, vector<4x8x8xbf16>, vector<4x8x8xf32> -> vector<4x8x8xf32>
    "tpu.trace_stop"() : () -> ()
    %33 = tpu.transpose %32, [1, 0, 2] : vector<4x8x8xf32> -> vector<8x4x8xf32>
    %34 = vector.shape_cast %33 : vector<8x4x8xf32> to vector<8x32xf32>
    %35 = arith.truncf %34 : vector<8x32xf32> to vector<8x32xbf16>
    %c0_11 = arith.constant 0 : index
    %c0_12 = arith.constant 0 : index
    %36 = vector.load %arg4[%c0_11, %c0_12] : memref<32x32xbf16, #tpu.memory_space<vmem>>, vector<32x32xbf16>
    %cst_13 = arith.constant dense<0.000000e+00> : vector<8x32xf32>
    %37 = tpu.matmul %35, %36, %cst_13 {dimension_numbers = #tpu.dot_dimension_numbers<[1], [0], [0], [1], [0, 0, 1, 1], [], []>} : vector<8x32xbf16>, vector<32x32xbf16>, vector<8x32xf32> -> vector<8x32xf32>
    %c0_14 = arith.constant 0 : index
    %c0_15 = arith.constant 0 : index
    %38 = vector.load %arg5[%c0_14, %c0_15] : memref<1x32xf32, #tpu.memory_space<vmem>>, vector<1x32xf32>
    %39 = vector.broadcast %38 : vector<1x32xf32> to vector<8x32xf32>
    %40 = arith.addf %37, %39 : vector<8x32xf32>
    %41 = arith.extf %1 : vector<8x32xbf16> to vector<8x32xf32>
    %42 = arith.addf %40, %41 : vector<8x32xf32>
    %c0_16 = arith.constant 0 : index
    %c0_17 = arith.constant 0 : index
    %43 = vector.load %arg6[%c0_16, %c0_17] : memref<1x32xf32, #tpu.memory_space<vmem>>, vector<1x32xf32>
    %c0_18 = arith.constant 0 : index
    %c0_19 = arith.constant 0 : index
    %44 = vector.load %arg7[%c0_18, %c0_19] : memref<1x32xf32, #tpu.memory_space<vmem>>, vector<1x32xf32>
    %cst_20 = arith.constant dense<0.000000e+00> : vector<8xf32>
    %45 = vector.multi_reduction <add>, %42, %cst_20 [1] : vector<8x32xf32> to vector<8xf32>
    %46 = vector.shape_cast %45 : vector<8xf32> to vector<8x1xf32>
    %cst_21 = arith.constant 3.200000e+01 : f32
    %47 = vector.broadcast %cst_21 : f32 to vector<8x1xf32>
    %48 = arith.divf %46, %47 : vector<8x1xf32>
    %49 = vector.broadcast %48 : vector<8x1xf32> to vector<8x32xf32>
    %50 = arith.subf %42, %49 : vector<8x32xf32>
    %51 = arith.mulf %50, %50 : vector<8x32xf32>
    %cst_22 = arith.constant dense<0.000000e+00> : vector<8xf32>
    %52 = vector.multi_reduction <add>, %51, %cst_22 [1] : vector<8x32xf32> to vector<8xf32>
    %53 = vector.shape_cast %52 : vector<8xf32> to vector<8x1xf32>
    %cst_23 = arith.constant 3.200000e+01 : f32
    %54 = vector.broadcast %cst_23 : f32 to vector<8x1xf32>
    %55 = arith.divf %53, %54 : vector<8x1xf32>
    %56 = vector.broadcast %48 : vector<8x1xf32> to vector<8x32xf32>
    %57 = arith.subf %42, %56 : vector<8x32xf32>
    %cst_24 = arith.constant 9.99999996E-13 : f32
    %58 = vector.broadcast %cst_24 : f32 to vector<8x1xf32>
    %59 = arith.addf %55, %58 : vector<8x1xf32>
    %60 = math.rsqrt %59 : vector<8x1xf32>
    %61 = vector.broadcast %60 : vector<8x1xf32> to vector<8x32xf32>
    %62 = arith.mulf %57, %61 : vector<8x32xf32>
    %63 = vector.broadcast %43 : vector<1x32xf32> to vector<8x32xf32>
    %64 = arith.mulf %62, %63 : vector<8x32xf32>
    %65 = vector.broadcast %44 : vector<1x32xf32> to vector<8x32xf32>
    %66 = arith.addf %64, %65 : vector<8x32xf32>
    %67 = arith.truncf %66 : vector<8x32xf32> to vector<8x32xbf16>
    %c0_25 = arith.constant 0 : index
    %c0_26 = arith.constant 0 : index
    %68 = vector.load %arg8[%c0_25, %c0_26] : memref<32x64xbf16, #tpu.memory_space<vmem>>, vector<32x64xbf16>
    %cst_27 = arith.constant dense<0.000000e+00> : vector<8x64xf32>
    %69 = tpu.matmul %67, %68, %cst_27 {dimension_numbers = #tpu.dot_dimension_numbers<[1], [0], [0], [1], [0, 0, 1, 1], [], []>} : vector<8x32xbf16>, vector<32x64xbf16>, vector<8x64xf32> -> vector<8x64xf32>
    %c0_28 = arith.constant 0 : index
    %c0_29 = arith.constant 0 : index
    %70 = vector.load %arg9[%c0_28, %c0_29] : memref<1x64xf32, #tpu.memory_space<vmem>>, vector<1x64xf32>
    %71 = vector.broadcast %70 : vector<1x64xf32> to vector<8x64xf32>
    %72 = arith.addf %69, %71 : vector<8x64xf32>
    %73 = arith.mulf %72, %72 : vector<8x64xf32>
    %74 = arith.mulf %72, %73 : vector<8x64xf32>
    %cst_30 = arith.constant 4.471500e-02 : f32
    %75 = vector.broadcast %cst_30 : f32 to vector<8x64xf32>
    %76 = arith.mulf %75, %74 : vector<8x64xf32>
    %77 = arith.addf %72, %76 : vector<8x64xf32>
    %cst_31 = arith.constant 0.797884583 : f32
    %78 = vector.broadcast %cst_31 : f32 to vector<8x64xf32>
    %79 = arith.mulf %78, %77 : vector<8x64xf32>
    %80 = math.tanh %79 : vector<8x64xf32>
    %cst_32 = arith.constant 1.000000e+00 : f32
    %81 = vector.broadcast %cst_32 : f32 to vector<8x64xf32>
    %82 = arith.addf %81, %80 : vector<8x64xf32>
    %cst_33 = arith.constant 5.000000e-01 : f32
    %83 = vector.broadcast %cst_33 : f32 to vector<8x64xf32>
    %84 = arith.mulf %83, %82 : vector<8x64xf32>
    %85 = arith.mulf %72, %84 : vector<8x64xf32>
    %86 = arith.truncf %85 : vector<8x64xf32> to vector<8x64xbf16>
    %c0_34 = arith.constant 0 : index
    %c0_35 = arith.constant 0 : index
    %87 = vector.load %arg10[%c0_34, %c0_35] : memref<64x32xbf16, #tpu.memory_space<vmem>>, vector<64x32xbf16>
    %cst_36 = arith.constant dense<0.000000e+00> : vector<8x32xf32>
    %88 = tpu.matmul %86, %87, %cst_36 {dimension_numbers = #tpu.dot_dimension_numbers<[1], [0], [0], [1], [0, 0, 1, 1], [], []>} : vector<8x64xbf16>, vector<64x32xbf16>, vector<8x32xf32> -> vector<8x32xf32>
    %c0_37 = arith.constant 0 : index
    %c0_38 = arith.constant 0 : index
    %89 = vector.load %arg11[%c0_37, %c0_38] : memref<1x32xf32, #tpu.memory_space<vmem>>, vector<1x32xf32>
    %90 = vector.broadcast %89 : vector<1x32xf32> to vector<8x32xf32>
    %91 = arith.addf %88, %90 : vector<8x32xf32>
    %92 = arith.addf %91, %66 : vector<8x32xf32>
    %c0_39 = arith.constant 0 : index
    %c0_40 = arith.constant 0 : index
    %93 = vector.load %arg12[%c0_39, %c0_40] : memref<1x32xf32, #tpu.memory_space<vmem>>, vector<1x32xf32>
    %c0_41 = arith.constant 0 : index
    %c0_42 = arith.constant 0 : index
    %94 = vector.load %arg13[%c0_41, %c0_42] : memref<1x32xf32, #tpu.memory_space<vmem>>, vector<1x32xf32>
    %cst_43 = arith.constant dense<0.000000e+00> : vector<8xf32>
    %95 = vector.multi_reduction <add>, %92, %cst_43 [1] : vector<8x32xf32> to vector<8xf32>
    %96 = vector.shape_cast %95 : vector<8xf32> to vector<8x1xf32>
    %cst_44 = arith.constant 3.200000e+01 : f32
    %97 = vector.broadcast %cst_44 : f32 to vector<8x1xf32>
    %98 = arith.divf %96, %97 : vector<8x1xf32>
    %99 = vector.broadcast %98 : vector<8x1xf32> to vector<8x32xf32>
    %100 = arith.subf %92, %99 : vector<8x32xf32>
    %101 = arith.mulf %100, %100 : vector<8x32xf32>
    %cst_45 = arith.constant dense<0.000000e+00> : vector<8xf32>
    %102 = vector.multi_reduction <add>, %101, %cst_45 [1] : vector<8x32xf32> to vector<8xf32>
    %103 = vector.shape_cast %102 : vector<8xf32> to vector<8x1xf32>
    %cst_46 = arith.constant 3.200000e+01 : f32
    %104 = vector.broadcast %cst_46 : f32 to vector<8x1xf32>
    %105 = arith.divf %103, %104 : vector<8x1xf32>
    %106 = vector.broadcast %98 : vector<8x1xf32> to vector<8x32xf32>
    %107 = arith.subf %92, %106 : vector<8x32xf32>
    %cst_47 = arith.constant 9.99999996E-13 : f32
    %108 = vector.broadcast %cst_47 : f32 to vector<8x1xf32>
    %109 = arith.addf %105, %108 : vector<8x1xf32>
    %110 = math.rsqrt %109 : vector<8x1xf32>
    %111 = vector.broadcast %110 : vector<8x1xf32> to vector<8x32xf32>
    %112 = arith.mulf %107, %111 : vector<8x32xf32>
    %113 = vector.broadcast %93 : vector<1x32xf32> to vector<8x32xf32>
    %114 = arith.mulf %112, %113 : vector<8x32xf32>
    %115 = vector.broadcast %94 : vector<1x32xf32> to vector<8x32xf32>
    %116 = arith.addf %114, %115 : vector<8x32xf32>
    %117 = arith.truncf %116 : vector<8x32xf32> to vector<8x32xbf16>
    %c0_48 = arith.constant 0 : index
    %c0_49 = arith.constant 0 : index
    %c0_50 = arith.constant 0 : index
    %118 = vector.load %arg14[%c0_48, %c0_49, %c0_50] : memref<1x8x32xbf16, #tpu.memory_space<vmem>>, vector<1x8x32xbf16>
    %119 = vector.shape_cast %118 : vector<1x8x32xbf16> to vector<8x32xbf16>
    %120 = vector.shape_cast %117 : vector<8x32xbf16> to vector<1x8x32xbf16>
    tpu.vector_store %arg14[%c0_48, %c0_49, %c0_50], %120 {strides = array<i32>} : memref<1x8x32xbf16, #tpu.memory_space<vmem>>, vector<1x8x32xbf16>,
    return
  }
  func.func @transform_0(%arg0: i32) -> (i32, i32, i32) {
    %c0_i32 = arith.constant 0 : i32
    %c0_i32_0 = arith.constant 0 : i32
    %c0_i32_1 = arith.constant 0 : i32
    return %arg0, %c0_i32, %c0_i32_0 : i32, i32, i32
  }
  func.func @transform_1(%arg0: i32) -> (i32, i32) {
    %c0_i32 = arith.constant 0 : i32
    %c0_i32_0 = arith.constant 0 : i32
    %c0_i32_1 = arith.constant 0 : i32
    return %c0_i32, %c0_i32_0 : i32, i32
  }
  func.func @transform_2(%arg0: i32) -> (i32, i32) {
    %c0_i32 = arith.constant 0 : i32
    %c0_i32_0 = arith.constant 0 : i32
    %c0_i32_1 = arith.constant 0 : i32
    return %c0_i32, %c0_i32_0 : i32, i32
  }
  func.func @transform_3(%arg0: i32) -> (i32, i32) {
    %c0_i32 = arith.constant 0 : i32
    %c0_i32_0 = arith.constant 0 : i32
    %c0_i32_1 = arith.constant 0 : i32
    return %c0_i32, %c0_i32_0 : i32, i32
  }
  func.func @transform_4(%arg0: i32) -> (i32, i32) {
    %c0_i32 = arith.constant 0 : i32
    %c0_i32_0 = arith.constant 0 : i32
    %c0_i32_1 = arith.constant 0 : i32
    return %c0_i32, %c0_i32_0 : i32, i32
  }
  func.func @transform_5(%arg0: i32) -> (i32, i32) {
    %c0_i32 = arith.constant 0 : i32
    %c0_i32_0 = arith.constant 0 : i32
    %c0_i32_1 = arith.constant 0 : i32
    return %c0_i32, %c0_i32_0 : i32, i32
  }
  func.func @transform_6(%arg0: i32) -> (i32, i32) {
    %c0_i32 = arith.constant 0 : i32
    %c0_i32_0 = arith.constant 0 : i32
    %c0_i32_1 = arith.constant 0 : i32
    return %c0_i32, %c0_i32_0 : i32, i32
  }
  func.func @transform_7(%arg0: i32) -> (i32, i32) {
    %c0_i32 = arith.constant 0 : i32
    %c0_i32_0 = arith.constant 0 : i32
    %c0_i32_1 = arith.constant 0 : i32
    return %c0_i32, %c0_i32_0 : i32, i32
  }
  func.func @transform_8(%arg0: i32) -> (i32, i32) {
    %c0_i32 = arith.constant 0 : i32
    %c0_i32_0 = arith.constant 0 : i32
    %c0_i32_1 = arith.constant 0 : i32
    return %c0_i32, %c0_i32_0 : i32, i32
  }
  func.func @transform_9(%arg0: i32) -> (i32, i32) {
    %c0_i32 = arith.constant 0 : i32
    %c0_i32_0 = arith.constant 0 : i32
    %c0_i32_1 = arith.constant 0 : i32
    return %c0_i32, %c0_i32_0 : i32, i32
  }
  func.func @transform_10(%arg0: i32) -> (i32, i32) {
    %c0_i32 = arith.constant 0 : i32
    %c0_i32_0 = arith.constant 0 : i32
    %c0_i32_1 = arith.constant 0 : i32
    return %c0_i32, %c0_i32_0 : i32, i32
  }
  func.func @transform_11(%arg0: i32) -> (i32, i32) {
    %c0_i32 = arith.constant 0 : i32
    %c0_i32_0 = arith.constant 0 : i32
    %c0_i32_1 = arith.constant 0 : i32
    return %c0_i32, %c0_i32_0 : i32, i32
  }
  func.func @transform_12(%arg0: i32) -> (i32, i32) {
    %c0_i32 = arith.constant 0 : i32
    %c0_i32_0 = arith.constant 0 : i32
    %c0_i32_1 = arith.constant 0 : i32
    return %c0_i32, %c0_i32_0 : i32, i32
  }
  func.func @transform_13(%arg0: i32) -> (i32, i32, i32) {
    %c0_i32 = arith.constant 0 : i32
    %c0_i32_0 = arith.constant 0 : i32
    %c0_i32_1 = arith.constant 0 : i32
    return %arg0, %c0_i32, %c0_i32_0 : i32, i32, i32
  }
}

module attributes {stable_mosaic.version = 11 : i64} {
  func.func @_layer_kernel(%arg0: i32, %arg1: memref<1x8x32xbf16, #tpu.memory_space<vmem>>, %arg2: memref<32x96xbf16, #tpu.memory_space<vmem>>, %arg3: memref<1x96xf32, #tpu.memory_space<vmem>>, %arg4: memref<32x32xbf16, #tpu.memory_space<vmem>>, %arg5: memref<1x32xf32, #tpu.memory_space<vmem>>, %arg6: memref<1x32xf32, #tpu.memory_space<vmem>>, %arg7: memref<1x32xf32, #tpu.memory_space<vmem>>, %arg8: memref<32x64xbf16, #tpu.memory_space<vmem>>, %arg9: memref<1x64xf32, #tpu.memory_space<vmem>>, %arg10: memref<64x32xbf16, #tpu.memory_space<vmem>>, %arg11: memref<1x32xf32, #tpu.memory_space<vmem>>, %arg12: memref<1x32xf32, #tpu.memory_space<vmem>>, %arg13: memref<1x32xf32, #tpu.memory_space<vmem>>, %arg14: memref<1x8x32xbf16, #tpu.memory_space<vmem>>) attributes {dimension_semantics = [#tpu.dimension_semantics<parallel>], iteration_bounds = array<i64: 2>, scalar_prefetch = 0 : i64, scratch_operands = 0 : i64, tpu.core_type = #tpu.core_type<tc>, window_params = [{transform_indices = @transform_0, window_bounds = array<i64: 1, 8, 32>}, {pipeline_mode = #tpu.pipeline_mode<synchronous>, transform_indices = @transform_1, window_bounds = array<i64: 32, 96>}, {pipeline_mode = #tpu.pipeline_mode<synchronous>, transform_indices = @transform_2, window_bounds = array<i64: 1, 96>}, {pipeline_mode = #tpu.pipeline_mode<synchronous>, transform_indices = @transform_3, window_bounds = array<i64: 32, 32>}, {pipeline_mode = #tpu.pipeline_mode<synchronous>, transform_indices = @transform_4, window_bounds = array<i64: 1, 32>}, {pipeline_mode = #tpu.pipeline_mode<synchronous>, transform_indices = @transform_5, window_bounds = array<i64: 1, 32>}, {pipeline_mode = #tpu.pipeline_mode<synchronous>, transform_indices = @transform_6, window_bounds = array<i64: 1, 32>}, {pipeline_mode = #tpu.pipeline_mode<synchronous>, transform_indices = @transform_7, window_bounds = array<i64: 32, 64>}, {pipeline_mode = #tpu.pipeline_mode<synchronous>, transform_indices = @transform_8, window_bounds = array<i64: 1, 64>}, {pipeline_mode = #tpu.pipeline_mode<synchronous>, transform_indices = @transform_9, window_bounds = array<i64: 64, 32>}, {pipeline_mode = #tpu.pipeline_mode<synchronous>, transform_indices = @transform_10, window_bounds = array<i64: 1, 32>}, {pipeline_mode = #tpu.pipeline_mode<synchronous>, transform_indices = @transform_11, window_bounds = array<i64: 1, 32>}, {pipeline_mode = #tpu.pipeline_mode<synchronous>, transform_indices = @transform_12, window_bounds = array<i64: 1, 32>}, {transform_indices = @transform_13, window_bounds = array<i64: 1, 8, 32>}]} {
    %c0 = arith.constant 0 : index
    %c0_0 = arith.constant 0 : index
    %c0_1 = arith.constant 0 : index
    %0 = vector.load %arg1[%c0, %c0_0, %c0_1] : memref<1x8x32xbf16, #tpu.memory_space<vmem>>, vector<1x8x32xbf16>
    %1 = vector.shape_cast %0 : vector<1x8x32xbf16> to vector<8x32xbf16>
    %c0_2 = arith.constant 0 : index
    %c0_3 = arith.constant 0 : index
    %2 = vector.load %arg2[%c0_2, %c0_3] : memref<32x96xbf16, #tpu.memory_space<vmem>>, vector<32x96xbf16>
    %cst = arith.constant dense<0.000000e+00> : vector<8x96xf32>
    %3 = tpu.matmul %1, %2, %cst {dimension_numbers = #tpu.dot_dimension_numbers<[1], [0], [0], [1], [0, 0, 1, 1], [], []>} : vector<8x32xbf16>, vector<32x96xbf16>, vector<8x96xf32> -> vector<8x96xf32>
    %c0_4 = arith.constant 0 : index
    %c0_5 = arith.constant 0 : index
    %4 = vector.load %arg3[%c0_4, %c0_5] : memref<1x96xf32, #tpu.memory_space<vmem>>, vector<1x96xf32>
    %5 = vector.broadcast %4 : vector<1x96xf32> to vector<8x96xf32>
    %6 = arith.addf %3, %5 : vector<8x96xf32>
    %7 = vector.extract_strided_slice %6 {offsets = [0, 0], sizes = [8, 32], strides = [1, 1]} : vector<8x96xf32> to vector<8x32xf32>
    %cst_6 = arith.constant 0.353553385 : f32
    %8 = vector.broadcast %cst_6 : f32 to vector<8x32xf32>
    %9 = arith.mulf %7, %8 : vector<8x32xf32>
    %10 = vector.extract_strided_slice %6 {offsets = [0, 32], sizes = [8, 32], strides = [1, 1]} : vector<8x96xf32> to vector<8x32xf32>
    %11 = vector.extract_strided_slice %6 {offsets = [0, 64], sizes = [8, 32], strides = [1, 1]} : vector<8x96xf32> to vector<8x32xf32>
    %12 = vector.shape_cast %9 : vector<8x32xf32> to vector<8x4x8xf32>
    %13 = tpu.transpose %12, [1, 0, 2] : vector<8x4x8xf32> -> vector<4x8x8xf32>
    %14 = arith.truncf %13 : vector<4x8x8xf32> to vector<4x8x8xbf16>
    %15 = vector.shape_cast %10 : vector<8x32xf32> to vector<8x4x8xf32>
    %16 = tpu.transpose %15, [1, 0, 2] : vector<8x4x8xf32> -> vector<4x8x8xf32>
    %17 = arith.truncf %16 : vector<4x8x8xf32> to vector<4x8x8xbf16>
    %18 = vector.shape_cast %11 : vector<8x32xf32> to vector<8x4x8xf32>
    %19 = tpu.transpose %18, [1, 0, 2] : vector<8x4x8xf32> -> vector<4x8x8xf32>
    %20 = arith.truncf %19 : vector<4x8x8xf32> to vector<4x8x8xbf16>
    "tpu.trace_start"() <{level = 10 : i32, message = "hqd,hkd->hqk"}> : () -> ()
    %cst_7 = arith.constant dense<0.000000e+00> : vector<4x8x8xf32>
    %21 = tpu.matmul %14, %17, %cst_7 {dimension_numbers = #tpu.dot_dimension_numbers<[2], [2], [1], [1], [0, 0, 0, 1, 1, 1], [0], [0]>} : vector<4x8x8xbf16>, vector<4x8x8xbf16>, vector<4x8x8xf32> -> vector<4x8x8xf32>
    "tpu.trace_stop"() : () -> ()
    %cst_8 = arith.constant dense<0xFF800000> : vector<4x8xf32>
    %22 = vector.multi_reduction <maximumf>, %21, %cst_8 [2] : vector<4x8x8xf32> to vector<4x8xf32>
    %23 = vector.shape_cast %22 : vector<4x8xf32> to vector<4x8x1xf32>
    %24 = vector.broadcast %23 : vector<4x8x1xf32> to vector<4x8x8xf32>
    %25 = arith.subf %21, %24 : vector<4x8x8xf32>
    %26 = math.exp %25 : vector<4x8x8xf32>
    %cst_9 = arith.constant dense<0.000000e+00> : vector<4x8xf32>
    %27 = vector.multi_reduction <add>, %26, %cst_9 [2] : vector<4x8x8xf32> to vector<4x8xf32>
    %28 = vector.shape_cast %27 : vector<4x8xf32> to vector<4x8x1xf32>
    %29 = vector.broadcast %28 : vector<4x8x1xf32> to vector<4x8x8xf32>
    %30 = arith.divf %26, %29 : vector<4x8x8xf32>
    %31 = arith.truncf %30 : vector<4x8x8xf32> to vector<4x8x8xbf16>
    "tpu.trace_start"() <{level = 10 : i32, message = "hqk,hkd->hqd"}> : () -> ()
    %cst_10 = arith.constant dense<0.000000e+00> : vector<4x8x8xf32>
    %32 = tpu.matmul %31, %20, %cst_10 {dimension_numbers = #tpu.dot_dimension_numbers<[2], [1], [1], [2], [0, 0, 0, 1, 1, 2], [0], [0]>} : vector<4x8x8xbf16>, vector<4x8x8xbf16>, vector<4x8x8xf32> -> vector<4x8x8xf32>
    "tpu.trace_stop"() : () -> ()
    %33 = tpu.transpose %32, [1, 0, 2] : vector<4x8x8xf32> -> vector<8x4x8xf32>
    %34 = vector.shape_cast %33 : vector<8x4x8xf32> to vector<8x32xf32>
    %35 = arith.truncf %34 : vector<8x32xf32> to vector<8x32xbf16>
    %c0_11 = arith.constant 0 : index
    %c0_12 = arith.constant 0 : index
    %36 = vector.load %arg4[%c0_11, %c0_12] : memref<32x32xbf16, #tpu.memory_space<vmem>>, vector<32x32xbf16>
    %cst_13 = arith.constant dense<0.000000e+00> : vector<8x32xf32>
    %37 = tpu.matmul %35, %36, %cst_13 {dimension_numbers = #tpu.dot_dimension_numbers<[1], [0], [0], [1], [0, 0, 1, 1], [], []>} : vector<8x32xbf16>, vector<32x32xbf16>, vector<8x32xf32> -> vector<8x32xf32>
    %c0_14 = arith.constant 0 : index
    %c0_15 = arith.constant 0 : index
    %38 = vector.load %arg5[%c0_14, %c0_15] : memref<1x32xf32, #tpu.memory_space<vmem>>, vector<1x32xf32>
    %39 = vector.broadcast %38 : vector<1x32xf32> to vector<8x32xf32>
    %40 = arith.addf %37, %39 : vector<8x32xf32>
    %41 = arith.extf %1 : vector<8x32xbf16> to vector<8x32xf32>
    %42 = arith.addf %40, %41 : vector<8x32xf32>
    %c0_16 = arith.constant 0 : index
    %c0_17 = arith.constant 0 : index
    %43 = vector.load %arg6[%c0_16, %c0_17] : memref<1x32xf32, #tpu.memory_space<vmem>>, vector<1x32xf32>
    %c0_18 = arith.constant 0 : index
    %c0_19 = arith.constant 0 : index
    %44 = vector.load %arg7[%c0_18, %c0_19] : memref<1x32xf32, #tpu.memory_space<vmem>>, vector<1x32xf32>
    %cst_20 = arith.constant dense<0.000000e+00> : vector<8xf32>
    %45 = vector.multi_reduction <add>, %42, %cst_20 [1] : vector<8x32xf32> to vector<8xf32>
    %46 = vector.shape_cast %45 : vector<8xf32> to vector<8x1xf32>
    %cst_21 = arith.constant 3.200000e+01 : f32
    %47 = vector.broadcast %cst_21 : f32 to vector<8x1xf32>
    %48 = arith.divf %46, %47 : vector<8x1xf32>
    %49 = vector.broadcast %48 : vector<8x1xf32> to vector<8x32xf32>
    %50 = arith.subf %42, %49 : vector<8x32xf32>
    %51 = arith.mulf %50, %50 : vector<8x32xf32>
    %cst_22 = arith.constant dense<0.000000e+00> : vector<8xf32>
    %52 = vector.multi_reduction <add>, %51, %cst_22 [1] : vector<8x32xf32> to vector<8xf32>
    %53 = vector.shape_cast %52 : vector<8xf32> to vector<8x1xf32>
    %cst_23 = arith.constant 3.200000e+01 : f32
    %54 = vector.broadcast %cst_23 : f32 to vector<8x1xf32>
    %55 = arith.divf %53, %54 : vector<8x1xf32>
    %56 = vector.broadcast %48 : vector<8x1xf32> to vector<8x32xf32>
    %57 = arith.subf %42, %56 : vector<8x32xf32>
    %cst_24 = arith.constant 9.99999996E-13 : f32
    %58 = vector.broadcast %cst_24 : f32 to vector<8x1xf32>
    %59 = arith.addf %55, %58 : vector<8x1xf32>
    %60 = math.rsqrt %59 : vector<8x1xf32>
    %61 = vector.broadcast %60 : vector<8x1xf32> to vector<8x32xf32>
    %62 = arith.mulf %57, %61 : vector<8x32xf32>
    %63 = vector.broadcast %43 : vector<1x32xf32> to vector<8x32xf32>
    %64 = arith.mulf %62, %63 : vector<8x32xf32>
    %65 = vector.broadcast %44 : vector<1x32xf32> to vector<8x32xf32>
    %66 = arith.addf %64, %65 : vector<8x32xf32>
    %67 = arith.truncf %66 : vector<8x32xf32> to vector<8x32xbf16>
    %c0_25 = arith.constant 0 : index
    %c0_26 = arith.constant 0 : index
    %68 = vector.load %arg8[%c0_25, %c0_26] : memref<32x64xbf16, #tpu.memory_space<vmem>>, vector<32x64xbf16>
    %cst_27 = arith.constant dense<0.000000e+00> : vector<8x64xf32>
    %69 = tpu.matmul %67, %68, %cst_27 {dimension_numbers = #tpu.dot_dimension_numbers<[1], [0], [0], [1], [0, 0, 1, 1], [], []>} : vector<8x32xbf16>, vector<32x64xbf16>, vector<8x64xf32> -> vector<8x64xf32>
    %c0_28 = arith.constant 0 : index
    %c0_29 = arith.constant 0 : index
    %70 = vector.load %arg9[%c0_28, %c0_29] : memref<1x64xf32, #tpu.memory_space<vmem>>, vector<1x64xf32>
    %71 = vector.broadcast %70 : vector<1x64xf32> to vector<8x64xf32>
    %72 = arith.addf %69, %71 : vector<8x64xf32>
    %73 = arith.mulf %72, %72 : vector<8x64xf32>
    %74 = arith.mulf %72, %73 : vector<8x64xf32>
    %cst_30 = arith.constant 4.471500e-02 : f32
    %75 = vector.broadcast %cst_30 : f32 to vector<8x64xf32>
    %76 = arith.mulf %75, %74 : vector<8x64xf32>
    %77 = arith.addf %72, %76 : vector<8x64xf32>
    %cst_31 = arith.constant 0.797884583 : f32
    %78 = vector.broadcast %cst_31 : f32 to vector<8x64xf32>
    %79 = arith.mulf %78, %77 : vector<8x64xf32>
    %80 = math.tanh %79 : vector<8x64xf32>
    %cst_32 = arith.constant 1.000000e+00 : f32
    %81 = vector.broadcast %cst_32 : f32 to vector<8x64xf32>
    %82 = arith.addf %81, %80 : vector<8x64xf32>
    %cst_33 = arith.constant 5.000000e-01 : f32
    %83 = vector.broadcast %cst_33 : f32 to vector<8x64xf32>
    %84 = arith.mulf %83, %82 : vector<8x64xf32>
    %85 = arith.mulf %72, %84 : vector<8x64xf32>
    %86 = arith.truncf %85 : vector<8x64xf32> to vector<8x64xbf16>
    %c0_34 = arith.constant 0 : index
    %c0_35 = arith.constant 0 : index
    %87 = vector.load %arg10[%c0_34, %c0_35] : memref<64x32xbf16, #tpu.memory_space<vmem>>, vector<64x32xbf16>
    %cst_36 = arith.constant dense<0.000000e+00> : vector<8x32xf32>
    %88 = tpu.matmul %86, %87, %cst_36 {dimension_numbers = #tpu.dot_dimension_numbers<[1], [0], [0], [1], [0, 0, 1, 1], [], []>} : vector<8x64xbf16>, vector<64x32xbf16>, vector<8x32xf32> -> vector<8x32xf32>
    %c0_37 = arith.constant 0 : index
    %c0_38 = arith.constant 0 : index
    %89 = vector.load %arg11[%c0_37, %c0_38] : memref<1x32xf32, #tpu.memory_space<vmem>>, vector<1x32xf32>
    %90 = vector.broadcast %89 : vector<1x32xf32> to vector<8x32xf32>
    %91 = arith.addf %88, %90 : vector<8x32xf32>
    %92 = arith.addf %91, %66 : vector<8x32xf32>
    %c0_39 = arith.constant 0 : index
    %c0_40 = arith.constant 0 : index
    %93 = vector.load %arg12[%c0_39, %c0_40] : memref<1x32xf32, #tpu.memory_space<vmem>>, vector<1x32xf32>
    %c0_41 = arith.constant 0 : index
    %c0_42 = arith.constant 0 : index
    %94 = vector.load %arg13[%c0_41, %c0_42] : memref<1x32xf32, #tpu.memory_space<vmem>>, vector<1x32xf32>
    %cst_43 = arith.constant dense<0.000000e+00> : vector<8xf32>
    %95 = vector.multi_reduction <add>, %92, %cst_43 [1] : vector<8x32xf32> to vector<8xf32>
    %96 = vector.shape_cast %95 : vector<8xf32> to vector<8x1xf32>
    %cst_44 = arith.constant 3.200000e+01 : f32
    %97 = vector.broadcast %cst_44 : f32 to vector<8x1xf32>
    %98 = arith.divf %96, %97 : vector<8x1xf32>
    %99 = vector.broadcast %98 : vector<8x1xf32> to vector<8x32xf32>
    %100 = arith.subf %92, %99 : vector<8x32xf32>
    %101 = arith.mulf %100, %100 : vector<8x32xf32>
    %cst_45 = arith.constant dense<0.000000e+00> : vector<8xf32>
    %102 = vector.multi_reduction <add>, %101, %cst_45 [1] : vector<8x32xf32> to vector<8xf32>
    %103 = vector.shape_cast %102 : vector<8xf32> to vector<8x1xf32>
    %cst_46 = arith.constant 3.200000e+01 : f32
    %104 = vector.broadcast %cst_46 : f32 to vector<8x1xf32>
    %105 = arith.divf %103, %104 : vector<8x1xf32>
    %106 = vector.broadcast %98 : vector<8x1xf32> to vector<8x32xf32>
    %107 = arith.subf %92, %106 : vector<8x32xf32>
    %cst_47 = arith.constant 9.99999996E-13 : f32
    %108 = vector.broadcast %cst_47 : f32 to vector<8x1xf32>
    %109 = arith.addf %105, %108 : vector<8x1xf32>
    %110 = math.rsqrt %109 : vector<8x1xf32>
    %111 = vector.broadcast %110 : vector<8x1xf32> to vector<8x32xf32>
    %112 = arith.mulf %107, %111 : vector<8x32xf32>
    %113 = vector.broadcast %93 : vector<1x32xf32> to vector<8x32xf32>
    %114 = arith.mulf %112, %113 : vector<8x32xf32>
    %115 = vector.broadcast %94 : vector<1x32xf32> to vector<8x32xf32>
    %116 = arith.addf %114, %115 : vector<8x32xf32>
    %117 = arith.truncf %116 : vector<8x32xf32> to vector<8x32xbf16>
    %c0_48 = arith.constant 0 : index
    %c0_49 = arith.constant 0 : index
    %c0_50 = arith.constant 0 : index
    %118 = vector.load %arg14[%c0_48, %c0_49, %c0_50] : memref<1x8x32xbf16, #tpu.memory_space<vmem>>, vector<1x8x32xbf16>
    %119 = vector.shape_cast %118 : vector<1x8x32xbf16> to vector<8x32xbf16>
    %120 = vector.shape_cast %117 : vector<8x32xbf16> to vector<1x8x32xbf16>
    tpu.vector_store %arg14[%c0_48, %c0_49, %c0_50], %120 {strides = array<i32>} : memref<1x8x32xbf16, #tpu.memory_space<vmem>>, vector<1x8x32xbf16>,
    return
  }
  func.func @transform_0(%arg0: i32) -> (i32, i32, i32) {
    %c0_i32 = arith.constant 0 : i32
    %c0_i32_0 = arith.constant 0 : i32
    %c0_i32_1 = arith.constant 0 : i32
    return %arg0, %c0_i32, %c0_i32_0 : i32, i32, i32
  }
  func.func @transform_1(%arg0: i32) -> (i32, i32) {
    %c0_i32 = arith.constant 0 : i32
    %c0_i32_0 = arith.constant 0 : i32
    %c0_i32_1 = arith.constant 0 : i32
    return %c0_i32, %c0_i32_0 : i32, i32
  }
  func.func @transform_2(%arg0: i32) -> (i32, i32) {
    %c0_i32 = arith.constant 0 : i32
    %c0_i32_0 = arith.constant 0 : i32
    %c0_i32_1 = arith.constant 0 : i32
    return %c0_i32, %c0_i32_0 : i32, i32
  }
  func.func @transform_3(%arg0: i32) -> (i32, i32) {
    %c0_i32 = arith.constant 0 : i32
    %c0_i32_0 = arith.constant 0 : i32
    %c0_i32_1 = arith.constant 0 : i32
    return %c0_i32, %c0_i32_0 : i32, i32
  }
  func.func @transform_4(%arg0: i32) -> (i32, i32) {
    %c0_i32 = arith.constant 0 : i32
    %c0_i32_0 = arith.constant 0 : i32
    %c0_i32_1 = arith.constant 0 : i32
    return %c0_i32, %c0_i32_0 : i32, i32
  }
  func.func @transform_5(%arg0: i32) -> (i32, i32) {
    %c0_i32 = arith.constant 0 : i32
    %c0_i32_0 = arith.constant 0 : i32
    %c0_i32_1 = arith.constant 0 : i32
    return %c0_i32, %c0_i32_0 : i32, i32
  }
  func.func @transform_6(%arg0: i32) -> (i32, i32) {
    %c0_i32 = arith.constant 0 : i32
    %c0_i32_0 = arith.constant 0 : i32
    %c0_i32_1 = arith.constant 0 : i32
    return %c0_i32, %c0_i32_0 : i32, i32
  }
  func.func @transform_7(%arg0: i32) -> (i32, i32) {
    %c0_i32 = arith.constant 0 : i32
    %c0_i32_0 = arith.constant 0 : i32
    %c0_i32_1 = arith.constant 0 : i32
    return %c0_i32, %c0_i32_0 : i32, i32
  }
  func.func @transform_8(%arg0: i32) -> (i32, i32) {
    %c0_i32 = arith.constant 0 : i32
    %c0_i32_0 = arith.constant 0 : i32
    %c0_i32_1 = arith.constant 0 : i32
    return %c0_i32, %c0_i32_0 : i32, i32
  }
  func.func @transform_9(%arg0: i32) -> (i32, i32) {
    %c0_i32 = arith.constant 0 : i32
    %c0_i32_0 = arith.constant 0 : i32
    %c0_i32_1 = arith.constant 0 : i32
    return %c0_i32, %c0_i32_0 : i32, i32
  }
  func.func @transform_10(%arg0: i32) -> (i32, i32) {
    %c0_i32 = arith.constant 0 : i32
    %c0_i32_0 = arith.constant 0 : i32
    %c0_i32_1 = arith.constant 0 : i32
    return %c0_i32, %c0_i32_0 : i32, i32
  }
  func.func @transform_11(%arg0: i32) -> (i32, i32) {
    %c0_i32 = arith.constant 0 : i32
    %c0_i32_0 = arith.constant 0 : i32
    %c0_i32_1 = arith.constant 0 : i32
    return %c0_i32, %c0_i32_0 : i32, i32
  }
  func.func @transform_12(%arg0: i32) -> (i32, i32) {
    %c0_i32 = arith.constant 0 : i32
    %c0_i32_0 = arith.constant 0 : i32
    %c0_i32_1 = arith.constant 0 : i32
    return %c0_i32, %c0_i32_0 : i32, i32
  }
  func.func @transform_13(%arg0: i32) -> (i32, i32, i32) {
    %c0_i32 = arith.constant 0 : i32
    %c0_i32_0 = arith.constant 0 : i32
    %c0_i32_1 = arith.constant 0 : i32
    return %arg0, %c0_i32, %c0_i32_0 : i32, i32, i32
  }
}

</mosaic_0001>

<bundles_post_ra>
// kernel: custom-call
= control target key start
LH: loop header
LB: loop body
LE: loop exit
PB: predicated region body
PF: predicated region fallthrough
CT: control target
= control target key end

     0   :  { %s6_s0 = inlined_call_operand.vmem [shape: f32[3,2,2], index: 0, kind: output, shape index: {}]  }

// kernel: closed_call.6
= control target key start
LH: loop header
LB: loop body
LE: loop exit
PB: predicated region body
PF: predicated region fallthrough
CT: control target
= control target key end

     0   :  { %s2186_s25 = smov 0   ;;  %s2446_s0 = inlined_call_operand.vmem [shape: bf16[2,8,32], index: 0, kind: input, shape index: {}]   ;;  %s2447_s1 = inlined_call_operand.vmem [shape: bf16[32,96], index: 1, kind: input, shape index: {}]   ;;  %s2448_s2 = inlined_call_operand.vmem [shape: f32[1,96], index: 2, kind: input, shape index: {}]   ;;  %s2449_s3 = inlined_call_operand.vmem [shape: bf16[32,32], index: 3, kind: input, shape index: {}]   ;;  %s2450_s4 = inlined_call_operand.vmem [shape: f32[1,32], index: 4, kind: input, shape index: {}]   ;;  %s2451_s5 = inlined_call_operand.vmem [shape: f32[1,32], index: 5, kind: input, shape index: {}]   ;;  %s2452_s6 = inlined_call_operand.vmem [shape: f32[1,32], index: 6, kind: input, shape index: {}]   ;;  %s2453_s7 = inlined_call_operand.vmem [shape: bf16[32,64], index: 7, kind: input, shape index: {}]   ;;  %s2454_s8 = inlined_call_operand.vmem [shape: f32[1,64], index: 8, kind: input, shape index: {}]   ;;  %s2455_s9 = inlined_call_operand.vmem [shape: bf16[64,32], index: 9, kind: input, shape index: {}]   ;;  %s2456_s10 = inlined_call_operand.vmem [shape: f32[1,32], index: 10, kind: input, shape index: {}]   ;;  %s2457_s11 = inlined_call_operand.vmem [shape: f32[1,32], index: 11, kind: input, shape index: {}]   ;;  %s2458_s12 = inlined_call_operand.vmem [shape: f32[1,32], index: 12, kind: input, shape index: {}]   ;;  %s2459_s13 = inlined_call_operand.vmem [shape: bf16[2,8,32], index: 13, kind: output, shape index: {}]  }
   0x1 LB: > { %s1883_s26 = sadd.s32 4294967295, %s2102_s25   ;;  %p1887_p0 = scmp.ge.s32.totalorder %s2102_s25, 1  ;;  %s2102_s25 = sphi %s2186_s25, %s23_s25  }
   0x2   : > { %p386_p1 = scmp.lt.s32.totalorder %s2102_s25, 3 }
   0x4   : > { %p387_p2 = pnand %p1887_p0, %p386_p1 }
   0x5   : > { %p428_p3 = scmp.lt.s32.totalorder (!%p387_p2), %s1883_s26, 1  ;;  %s2106_s20 = smov (!%p387_p2), 104  }
   0x6   : > { %390 = sbr.rel (%p387_p2) target bundleno = 2617 (0xa39), region = 72  ;;  %s2107_s21 = smov (!%p387_p2), 120  }
   0x7   : > { %s2108_s22 = smov (!%p387_p2), 96   ;;  %s2109_s23 = smov (!%p387_p2), 112  }
   0x8   : > { %s2112_s24 = smov (!%p387_p2), 64   ;;  %s2113_s15 = smov (!%p387_p2), 16  }
   0x9   : > { %s2114_s16 = smov (!%p387_p2), 8  }
   0xb   : > { %v2064_v0 = vld [vmem:[%s2447_s1 + $0x8] sm:$0xff]   ;;  %v2104_v1 = vmov 0.0   ;;  %v2065_v2 = vld [vmem:[%s2447_s1] sm:$0xff]   ;;  %vm2105_vm0 = vmmov 0   ;;  %s2461_s26 = smov (!%p428_p3, %s1883_s26), 1  ;;  %vm461_vm1 = vcmask 261120   ;;  %v521_v16 = vlaneseq }
   0xc   : > { %1960 = vmatprep.subr.bf16.mxu0 %v2104_v1  ;;  %1968 = vmatprep.subr.bf16.mxu1 %v2104_v1  ;;  %s1888_s14 = sshll.u32 %s2461_s26, 2  ;;  %v1890_v4 = vld [vmem:[%s2448_s2] ss:$0 sm:$0xff]  ;;  %v2110_v14 = vmov 1983009808   ;;  %vm967_vm2 = vcmask 64512  }
   0xd   : > { %1961 = vmatpush3.bf16.msra.mxu0 %v2064_v0  ;;  %1964 = vmatprep.mubr.msk.bf16.mxu0 %vm2105_vm0, %v2104_v1  ;;  %s431_s17 = scalar_lea.vmem %s2446_s0, %s1888_s14  ;;  %v519_v15 = vunpack.c.l.s4 %v2110_v14  ;;  %v2111_v17 = vmov 1934713408   ;;  %v522_v20 = vshrl.u32 %v521_v16, 7  ;;  %vm1203_vm3 = vcmask 1043456   ;;  %s435_s18 = scalar_lea.vmem %s2459_s13, %s1888_s14 }
   0xe   : > { %1962 = vmatprep.subr.bf16.mxu0 %v2104_v1  ;;  %1970 = vmatprep.mubr.msk.bf16.mxu1 %vm2105_vm0, %v2104_v1  ;;  %v2216_v3 = vld [vmem:[%s431_s17] sm:$0xf]  ;;  %v551_v18 = vunpack.c.l.s4 %v2111_v17  ;;  %s2115_s17 = smov 24   ;;  %vm1534_vm4 = vcmask 130048   ;;  %vm1536_vm5 = vcmask 195584   ;;  %vm1753_vm6 = vcmask 523264  }
   0xf   : > { %v520_v19 = vunpack.c.0.s8 %v519_v15  ;;  %vm1828_vm7 = vcmask 257024  }
  0x10   : > { %v552_v23 = vunpack.c.0.s8 %v551_v18 }
  0x11   : > { %1963 = vmatpush3.bf16.msra.mxu0 %v2065_v2  ;;  %v2241_v24 = vsub.s32 %v520_v19, %v522_v20 }
  0x12   : > { %1974 = vmatprep.subr.bf16.mxu0 %v2104_v1  ;;  %v2243_v31 = vsub.s32 %v552_v23, %v522_v20 }
  0x14   : > { %1965 = vmatmul.mubr.msk.bf16.vlgmr.msra.gmra.mxu0 %vm461_vm1, %v2216_v3 }
  0x15   : > { %1976 = vmatprep.mubr.msk.bf16.mxu0 %vm2105_vm0, %v2104_v1 }
  0xd4   : > { %v499_v5 = vpop.f32.mrf.mxu0 }
  0xd5   : > { %v2225_v6 = vadd.f32 %v1890_v4, %v499_v5 }
  0xd6   : > { %v1966_v7 = vpop.f32.mrf.mxu0 }
  0xd7   : > { %661 = vrot.lane.b32.xlu1 %v2225_v6, %s2106_s20  ;;  %657 = vrot.lane.b32.xlu0 %v2225_v6, %s2107_s21  ;;  %v505_v13 = vmul.f32 0.35355338, %v2225_v6 }
  0xd8   : > { %v502_v8 = vpop.f32.mrf.mxu0 }
  0xda   : > { %v1967_v9 = vpop.f32.mrf.mxu0 }
  0xdb   : > { %663 = vrot.lane.b32.xlu1 %v2225_v6, %s2108_s22  ;;  %659 = vrot.lane.b32.xlu0 %v2225_v6, %s2109_s23 }
 0x149   : > { %v2231_v10 = vpop.permute.xlu0 %657  ;;  %v2234_v11 = vpop.permute.xlu1 %661 }
 0x14a   : > { %665 = vrot.lane.b32.xlu0 %v2231_v10, %s2108_s22 }
 0x14d   : > { %v2236_v12 = vpop.permute.xlu0 %659  ;;  %v664_v21 = vpop.permute.xlu1 %663 }
 0x14e   : > { %669 = vrot.lane.b32.xlu0 %v2234_v11, %s2108_s22  ;;  %667 = vrot.lane.b32.xlu1 %v2236_v12, %s2108_s22 }
 0x152   : > { %510 = vrot.lane.b32.xlu0 %v505_v13, %s2109_s23  ;;  %507 = vrot.lane.b32.xlu1 %v505_v13, %s2107_s21 }
 0x156   : > { %513 = vrot.lane.b32.xlu1 %v505_v13, %s2106_s20 }
 0x1bc   : > { %v666_v22 = vpop.permute.xlu0 %665 }
 0x1c0   : > { %v668_v25 = vpop.permute.xlu1 %667  ;;  %v670_v26 = vpop.permute.xlu0 %669 }
 0x1c1   : > { %v675_v27 = vcombine.low %v664_v21, %v668_v25  ;;  %v676_v28 = vcombine.high %v664_v21, %v668_v25  ;;  %v691_v29 = vcombine.low %v666_v22, %v670_v26  ;;  %v692_v30 = vcombine.high %v666_v22, %v670_v26 }
 0x1c3   : > { %v683_v32 = vrot.slane %v675_v27, %v2241_v24  ;;  %v690_v33 = vrot.slane %v676_v28, %v2241_v24  ;;  %v699_v34 = vrot.slane %v691_v29, %v2241_v24  ;;  %v706_v35 = vrot.slane %v692_v30, %v2241_v24 }
 0x1c4   : > { %v508_v36 = vpop.permute.xlu1 %507  ;;  %v511_v41 = vpop.permute.xlu0 %510 }
 0x1c5   : > { %v707_v37 = vcombine.low %v683_v32, %v699_v34  ;;  %v708_v38 = vcombine.high %v683_v32, %v699_v34  ;;  %v723_v39 = vcombine.low %v690_v33, %v706_v35  ;;  %v724_v40 = vcombine.high %v690_v33, %v706_v35 }
 0x1c6   : > { %v516_v46 = vcombine.low %v505_v13, %v511_v41  ;;  %v517_v47 = vcombine.high %v505_v13, %v511_v41 }
 0x1c7   : > { %v715_v42 = vrot.slane %v707_v37, %v2243_v31  ;;  %v722_v43 = vrot.slane %v708_v38, %v2243_v31  ;;  %v731_v44 = vrot.slane %v723_v39, %v2243_v31  ;;  %v738_v45 = vrot.slane %v724_v40, %v2243_v31 }
 0x1c8   : > { %v514_v48 = vpop.permute.xlu1 %513  ;;  %v524_v59 = vrot.slane %v516_v46, %v2241_v24  ;;  %v531_v60 = vrot.slane %v517_v47, %v2241_v24 }
 0x1c9   : > { %v743_v49 = vcombine.low %v715_v42, %v722_v43  ;;  %v1896_v50 = vcombine.high %v715_v42, %v722_v43  ;;  %v759_v51 = vcombine.low %v731_v44, %v738_v45  ;;  %v1897_v52 = vcombine.high %v731_v44, %v738_v45 }
 0x1ca   : > { %v532_v53 = vcombine.low %v508_v36, %v514_v48  ;;  %v533_v54 = vcombine.high %v508_v36, %v514_v48 }
 0x1cb   : > { %v750_v55 = vrot.slane %v743_v49, %v2241_v24  ;;  %v758_v56 = vrot.slane %v1896_v50, %v2241_v24  ;;  %v766_v57 = vrot.slane %v759_v51, %v2241_v24  ;;  %v774_v58 = vrot.slane %v1897_v52, %v2241_v24 }
 0x1cc   : > { %v540_v61 = vrot.slane %v532_v53, %v2241_v24  ;;  %v547_v62 = vrot.slane %v533_v54, %v2241_v24 }
 0x1cd   : > { %v775_v63 = vcombine.low %v750_v55, %v758_v56  ;;  %v791_v0 = vcombine.low %v766_v57, %v774_v58  ;;  %v776_v13 = vcombine.high %v750_v55, %v758_v56  ;;  %v792_v14 = vcombine.high %v766_v57, %v774_v58 }
 0x1ce   : > { %v548_v2 = vcombine.low %v524_v59, %v540_v61  ;;  %v549_v4 = vcombine.high %v524_v59, %v540_v61  ;;  %v564_v5 = vcombine.low %v531_v60, %v547_v62  ;;  %v565_v7 = vcombine.high %v531_v60, %v547_v62 }
 0x1cf   : > { %v783_v8 = vrot.slane %v775_v63, %v2243_v31  ;;  %v799_v9 = vrot.slane %v791_v0, %v2243_v31  ;;  %v790_v28 = vrot.slane %v776_v13, %v2243_v31  ;;  %v806_v29 = vrot.slane %v792_v14, %v2243_v31 }
 0x1d0   : > { %v556_v15 = vrot.slane %v548_v2, %v2243_v31  ;;  %v563_v16 = vrot.slane %v549_v4, %v2243_v31  ;;  %v572_v17 = vrot.slane %v564_v5, %v2243_v31  ;;  %v579_v18 = vrot.slane %v565_v7, %v2243_v31 }
 0x1d1   : > { %v807_v19 = vcombine.low %v783_v8, %v799_v9  ;;  %v808_v20 = vcombine.high %v783_v8, %v799_v9  ;;  %v809_v39 = vcombine.low %v790_v28, %v806_v29  ;;  %v810_v40 = vcombine.high %v790_v28, %v806_v29 }
 0x1d2   : > { %v584_v21 = vcombine.low %v556_v15, %v563_v16  ;;  %v1894_v22 = vcombine.high %v556_v15, %v563_v16  ;;  %v600_v23 = vcombine.low %v572_v17, %v579_v18  ;;  %v1895_v25 = vcombine.high %v572_v17, %v579_v18 }
 0x1d3   : > { %v811_v26 = vpack.c.bf16 %v807_v19, %v807_v19  ;;  %v812_v27 = vpack.c.bf16 %v808_v20, %v808_v20  ;;  %v813_v47 = vpack.c.bf16 %v809_v39, %v809_v39  ;;  %v814_v48 = vpack.c.bf16 %v810_v40, %v810_v40 }
 0x1d4   : > { %v591_v30 = vrot.slane %v584_v21, %v2241_v24  ;;  %v599_v32 = vrot.slane %v1894_v22, %v2241_v24  ;;  %v607_v33 = vrot.slane %v600_v23, %v2241_v24  ;;  %v615_v34 = vrot.slane %v1895_v25, %v2241_v24 }
 0x1d5   : > { %v972_v35 = vsel %vm967_vm2, %v811_v26, 0  ;;  %v1018_v36 = vsel %vm967_vm2, %v812_v27, 0  ;;  %v1064_v53 = vsel %vm967_vm2, %v813_v47, 0  ;;  %v1110_v54 = vsel %vm967_vm2, %v814_v48, 0 }
 0x1d6   : > { %1969 = vmatpush3.bf16.xpose.msra.mxu1 %v972_v35  ;;  %1975 = vmatpush3.bf16.xpose.msra.mxu0 %v1018_v36  ;;  %v616_v37 = vcombine.low %v591_v30, %v599_v32  ;;  %v632_v38 = vcombine.low %v607_v33, %v615_v34  ;;  %v617_v42 = vcombine.high %v591_v30, %v599_v32 }
 0x1d7   : > { %1980 = vmatprep.subr.bf16.mxu1 %v2104_v1  ;;  %1986 = vmatprep.subr.bf16.mxu0 %v2104_v1  ;;  %v633_v43 = vcombine.high %v607_v33, %v615_v34 }
 0x1d8   : > { %v624_v41 = vrot.slane %v616_v37, %v2243_v31  ;;  %v640_v44 = vrot.slane %v632_v38, %v2243_v31  ;;  %v631_v51 = vrot.slane %v617_v42, %v2243_v31 }
 0x1d9   : > { %v647_v52 = vrot.slane %v633_v43, %v2243_v31 }
 0x1da   : > { %v648_v45 = vcombine.low %v624_v41, %v640_v44  ;;  %v649_v46 = vcombine.high %v624_v41, %v640_v44 }
 0x1db   : > { %v650_v55 = vcombine.low %v631_v51, %v647_v52  ;;  %v651_v56 = vcombine.high %v631_v51, %v647_v52 }
 0x1dc   : > { %v652_v49 = vpack.c.bf16 %v648_v45, %v648_v45  ;;  %v653_v50 = vpack.c.bf16 %v649_v46, %v649_v46 }
 0x1dd   : > { %v654_v57 = vpack.c.bf16 %v650_v55, %v650_v55  ;;  %v655_v58 = vpack.c.bf16 %v651_v56, %v651_v56 }
 0x1de   : > { %1971 = vmatmul.mubr.msk.bf16.vlgmr.msra.gmra.mxu1 %vm967_vm2, %v652_v49  ;;  %1977 = vmatmul.mubr.msk.bf16.vlgmr.msra.gmra.mxu0 %vm967_vm2, %v653_v50 }
 0x1df   : > { %1981 = vmatpush3.bf16.xpose.msra.mxu1 %v1064_v53  ;;  %1987 = vmatpush3.bf16.xpose.msra.mxu0 %v1110_v54 }
 0x1e0   : > { %1982 = vmatprep.mubr.msk.bf16.mxu1 %vm2105_vm0, %v2104_v1  ;;  %1988 = vmatprep.mubr.msk.bf16.mxu0 %vm2105_vm0, %v2104_v1 }
 0x1e1   : > { %1992 = vmatprep.subr.bf16.mxu1 %v2104_v1  ;;  %1998 = vmatprep.subr.bf16.mxu0 %v2104_v1 }
 0x1e6   : > { %1983 = vmatmul.mubr.msk.bf16.vlgmr.msra.gmra.mxu1 %vm967_vm2, %v654_v57  ;;  %1989 = vmatmul.mubr.msk.bf16.vlgmr.msra.gmra.mxu0 %vm967_vm2, %v655_v58 }
 0x1e7   : > { %1994 = vmatprep.mubr.msk.bf16.mxu1 %vm2105_vm0, %v2104_v1  ;;  %2000 = vmatprep.mubr.msk.bf16.mxu0 %vm2105_vm0, %v2104_v1 }
 0x29e   : > { %v1008_v59 = vpop.f32.mrf.mxu1  ;;  %v1054_v60 = vpop.f32.mrf.mxu0 }
 0x29f   : > { %v1152_v61 = vsel %vm967_vm2, %v1008_v59, -inf  ;;  %v1155_v62 = vsel %vm967_vm2, %v1054_v60, -inf }
 0x2a0   : > { %1153 = vmax.xlane.f32.xlu0 %v1152_v61  ;;  %v1972_v63 = vpop.f32.mrf.mxu1  ;;  %1156 = vmax.xlane.f32.xlu1 %v1155_v62  ;;  %v1978_v0 = vpop.f32.mrf.mxu0 }
 0x2a2   : > { %v1011_v2 = vpop.f32.mrf.mxu1  ;;  %v1057_v4 = vpop.f32.mrf.mxu0 }
 0x2a4   : > { %v1973_v5 = vpop.f32.mrf.mxu1  ;;  %v1979_v7 = vpop.f32.mrf.mxu0 }
 0x2a6   : > { %v1100_v8 = vpop.f32.mrf.mxu1  ;;  %v1146_v9 = vpop.f32.mrf.mxu0 }
 0x2a7   : > { %v1158_v13 = vsel %vm967_vm2, %v1100_v8, -inf  ;;  %v1161_v18 = vsel %vm967_vm2, %v1146_v9, -inf }
 0x2a8   : > { %1159 = vmax.xlane.f32.xlu0 %v1158_v13  ;;  %v1984_v14 = vpop.f32.mrf.mxu1  ;;  %v1990_v15 = vpop.f32.mrf.mxu0 }
 0x2aa   : > { %v1103_v16 = vpop.f32.mrf.mxu1  ;;  %v1149_v17 = vpop.f32.mrf.mxu0 }
 0x2ac   : > { %v1985_v19 = vpop.f32.mrf.mxu1  ;;  %1162 = vmax.xlane.f32.xlu0 %v1161_v18  ;;  %v1991_v20 = vpop.f32.mrf.mxu0 }
 0x2b1   : > { %815 = vrot.lane.b32.xlu1 %v2225_v6, %s2112_s24 }
 0x329   : > { %v1154_v21 = vpop.xlane.xlu0 %1153  ;;  %v1157_v22 = vpop.xlane.xlu1 %1156 }
 0x32a   : > { %v1164_v23 = vsub.f32 %v1008_v59, %v1154_v21  ;;  %v1165_v25 = vsub.f32 %v1054_v60, %v1157_v22 }
 0x32c   : > { %v1168_v26 = vmul.f32 1.442695, %v1164_v23  ;;  %v1170_v27 = vmul.f32 1.442695, %v1165_v25 }
 0x32e   : > { %2074 = vpow2.f32 %v1168_v26 }
 0x32f   : > { %2076 = vpow2.f32 %v1170_v27 }
 0x331   : > { %v1160_v6 = vpop.xlane.xlu0 %1159 }
 0x332   : > { %v1166_v33 = vsub.f32 %v1100_v8, %v1160_v6 }
 0x334   : > { %v1172_v36 = vmul.f32 1.442695, %v1166_v33 }
 0x335   : > { %v1163_v34 = vpop.xlane.xlu0 %1162 }
 0x336   : > { %v1167_v35 = vsub.f32 %v1146_v9, %v1163_v34  ;;  %2078 = vpow2.f32 %v1172_v36 }
 0x338   : > { %v1174_v37 = vmul.f32 1.442695, %v1167_v35 }
 0x33a   : > { %2080 = vpow2.f32 %v1174_v37 }
 0x33b   : > { %v2302_v28 = vpop.eup %2074 }
 0x33c   : > { %v2304_v29 = vpop.eup %2076  ;;  %v1176_v30 = vsel %vm967_vm2, %v2302_v28, 0.0 }
 0x33d   : > { %1177 = vadd.xlane.f32.xlu1 %v1176_v30  ;;  %v1179_v32 = vsel %vm967_vm2, %v2304_v29, 0.0 }
 0x33e   : > { %1180 = vadd.xlane.f32.xlu0 %v1179_v32 }
 0x343   : > { %v2313_v38 = vpop.eup %2078 }
 0x344   : > { %v1182_v40 = vsel %vm967_vm2, %v2313_v38, 0.0 }
 0x347   : > { %v2315_v39 = vpop.eup %2080 }
 0x34e   : > { %819 = vrot.lane.b32.xlu1 %v2236_v12, %s2112_s24 }
 0x352   : > { %821 = vrot.lane.b32.xlu1 %v2234_v11, %s2112_s24  ;;  %v1185_v11 = vsel %vm967_vm2, %v2315_v39, 0.0 }
 0x354   : > { %817 = vrot.lane.b32.xlu0 %v2231_v10, %s2112_s24  ;;  %v816_v10 = vpop.permute.xlu1 %815 }
 0x373   : > { %1183 = vadd.xlane.f32.xlu0 %v1182_v40 }
 0x376   : > { %1186 = vadd.xlane.f32.xlu1 %v1185_v11 }
 0x3c6   : > { %v1178_v12 = vpop.xlane.xlu1 %1177 }
 0x3c7   : > { %v1181_v41 = vpop.xlane.xlu0 %1180  ;;  %2082 = vrcp.f32 %v1178_v12 }
 0x3c8   : > { %2084 = vrcp.f32 %v1181_v41 }
 0x3ca   : > { %v820_v42 = vpop.permute.xlu1 %819 }
 0x3cb   : > { %v827_v43 = vcombine.low %v816_v10, %v820_v42  ;;  %v828_v44 = vcombine.high %v816_v10, %v820_v42  ;;  %v818_v45 = vpop.permute.xlu0 %817 }
 0x3cd   : > { %v835_v49 = vrot.slane %v827_v43, %v2241_v24  ;;  %v842_v50 = vrot.slane %v828_v44, %v2241_v24 }
 0x3ce   : > { %v822_v46 = vpop.permute.xlu1 %821 }
 0x3cf   : > { %v843_v47 = vcombine.low %v818_v45, %v822_v46  ;;  %v844_v48 = vcombine.high %v818_v45, %v822_v46  ;;  %v2066_v45 = vld [vmem:[%s2449_s3 + $0x8] sm:$0xff]  }
 0x3d1   : > { %v851_v51 = vrot.slane %v843_v47, %v2241_v24  ;;  %v858_v52 = vrot.slane %v844_v48, %v2241_v24 }
 0x3d3   : > { %v859_v53 = vcombine.low %v835_v49, %v851_v51  ;;  %v860_v54 = vcombine.high %v835_v49, %v851_v51  ;;  %v875_v55 = vcombine.low %v842_v50, %v858_v52  ;;  %v876_v56 = vcombine.high %v842_v50, %v858_v52 }
 0x3d4   : > { %v2083_v15 = vpop.eup %2082 }
 0x3d5   : > { %v867_v57 = vrot.slane %v859_v53, %v2243_v31  ;;  %v874_v58 = vrot.slane %v860_v54, %v2243_v31  ;;  %v883_v59 = vrot.slane %v875_v55, %v2243_v31  ;;  %v890_v60 = vrot.slane %v876_v56, %v2243_v31  ;;  %v2085_v16 = vpop.eup %2084 }
 0x3d6   : > { %v1189_v30 = vmul.f32 %v2083_v15, %v2302_v28  ;;  %v1191_v32 = vmul.f32 %v2085_v16, %v2304_v29 }
 0x3d7   : > { %v895_v61 = vcombine.low %v867_v57, %v874_v58  ;;  %v1898_v62 = vcombine.high %v867_v57, %v874_v58  ;;  %v911_v63 = vcombine.low %v883_v59, %v890_v60  ;;  %v1899_v0 = vcombine.high %v883_v59, %v890_v60 }
 0x3d8   : > { %v1196_v36 = vpack.c.bf16 %v1189_v30, %v1189_v30  ;;  %v1197_v37 = vpack.c.bf16 %v1191_v32, %v1191_v32 }
 0x3d9   : > { %v902_v2 = vrot.slane %v895_v61, %v2241_v24  ;;  %v910_v4 = vrot.slane %v1898_v62, %v2241_v24  ;;  %v918_v5 = vrot.slane %v911_v63, %v2241_v24  ;;  %v926_v7 = vrot.slane %v1899_v0, %v2241_v24 }
 0x3db   : > { %v927_v8 = vcombine.low %v902_v2, %v910_v4  ;;  %v943_v9 = vcombine.low %v918_v5, %v926_v7  ;;  %v928_v13 = vcombine.high %v902_v2, %v910_v4  ;;  %v944_v14 = vcombine.high %v918_v5, %v926_v7 }
 0x3dd   : > { %v935_v17 = vrot.slane %v927_v8, %v2243_v31  ;;  %v951_v18 = vrot.slane %v943_v9, %v2243_v31  ;;  %v942_v19 = vrot.slane %v928_v13, %v2243_v31  ;;  %v958_v20 = vrot.slane %v944_v14, %v2243_v31  ;;  %v2067_v14 = vld [vmem:[%s2449_s3] sm:$0xff]  }
 0x3df   : > { %v959_v21 = vcombine.low %v935_v17, %v951_v18  ;;  %v960_v22 = vcombine.high %v935_v17, %v951_v18  ;;  %v961_v23 = vcombine.low %v942_v19, %v958_v20  ;;  %v962_v25 = vcombine.high %v942_v19, %v958_v20 }
 0x3e1   : > { %v963_v26 = vpack.c.bf16 %v959_v21, %v959_v21  ;;  %v964_v27 = vpack.c.bf16 %v960_v22, %v960_v22  ;;  %v965_v34 = vpack.c.bf16 %v961_v23, %v961_v23  ;;  %v966_v35 = vpack.c.bf16 %v962_v25, %v962_v25 }
 0x3e3   : > { %v1205_v6 = vsel %vm1203_vm3, %v963_v26, 0  ;;  %v1251_v33 = vsel %vm1203_vm3, %v964_v27, 0  ;;  %v1297_v28 = vsel %vm1203_vm3, %v965_v34, 0  ;;  %v1343_v29 = vsel %vm1203_vm3, %v966_v35, 0 }
 0x3e4   : > { %1993 = vmatpush3.bf16.msra.mxu1 %v1205_v6  ;;  %1999 = vmatpush3.bf16.msra.mxu0 %v1251_v33 }
 0x3e5   : > { %2004 = vmatprep.subr.bf16.mxu1 %v2104_v1  ;;  %2010 = vmatprep.subr.bf16.mxu0 %v2104_v1 }
 0x3e7   : > { %1995 = vmatmul.mubr.msk.bf16.vlgmr.msra.gmra.mxu1 %vm967_vm2, %v1196_v36  ;;  %2001 = vmatmul.mubr.msk.bf16.vlgmr.msra.gmra.mxu0 %vm967_vm2, %v1197_v37 }
 0x3e8   : > { %2005 = vmatpush3.bf16.msra.mxu1 %v1297_v28  ;;  %2011 = vmatpush3.bf16.msra.mxu0 %v1343_v29 }
 0x3e9   : > { %2006 = vmatprep.mubr.msk.bf16.mxu1 %vm2105_vm0, %v2104_v1  ;;  %2012 = vmatprep.mubr.msk.bf16.mxu0 %vm2105_vm0, %v2104_v1 }
 0x3ea   : > { %2016 = vmatprep.subr.bf16.mxu1 %v2104_v1  ;;  %2024 = vmatprep.subr.bf16.mxu0 %v2104_v1 }
 0x3fc   : > { %v1184_v40 = vpop.xlane.xlu0 %1183 }
 0x3fd   : > { %2086 = vrcp.f32 %v1184_v40 }
 0x3ff   : > { %v1187_v11 = vpop.xlane.xlu1 %1186 }
 0x400   : > { %2088 = vrcp.f32 %v1187_v11 }
 0x40a   : > { %v2087_v10 = vpop.eup %2086 }
 0x40b   : > { %v1193_v12 = vmul.f32 %v2087_v10, %v2313_v38 }
 0x40d   : > { %v2089_v41 = vpop.eup %2088  ;;  %v1198_v42 = vpack.c.bf16 %v1193_v12, %v1193_v12 }
 0x40e   : > { %v1195_v43 = vmul.f32 %v2089_v41, %v2315_v39 }
 0x40f   : > { %2007 = vmatmul.mubr.msk.bf16.vlgmr.msra.gmra.mxu1 %vm967_vm2, %v1198_v42 }
 0x410   : > { %v1199_v44 = vpack.c.bf16 %v1195_v43, %v1195_v43  ;;  %2020 = vmatprep.mubr.msk.bf16.mxu1 %vm2105_vm0, %v2104_v1  ;;  %2017 = vmatpush3.bf16.msra.mxu1 %v2066_v45  ;;  %v1605_v45 = vunpack.c.l.bf16 %v2216_v3  ;;  %v2068_v3 = vld [vmem:[%s2453_s7 + $0x8] sm:$0xff]  }
 0x411   : > { %2018 = vmatprep.subr.bf16.mxu1 %v2104_v1 }
 0x412   : > { %2013 = vmatmul.mubr.msk.bf16.vlgmr.msra.gmra.mxu0 %vm967_vm2, %v1199_v44  ;;  %v1910_v44 = vld [vmem:[%s2450_s4] ss:$0 sm:$0xff] }
 0x413   : > { %2028 = vmatprep.mubr.msk.bf16.mxu0 %vm2105_vm0, %v2104_v1  ;;  %2025 = vmatpush3.bf16.msra.mxu0 %v2068_v3 }
 0x414   : > { %2019 = vmatpush3.bf16.msra.mxu1 %v2067_v14  ;;  %2026 = vmatprep.subr.bf16.mxu0 %v2104_v1 }
 0x415   : > { %2032 = vmatprep.subr.bf16.mxu1 %v2104_v1 }
 0x4a7   : > { %v1241_v38 = vpop.f32.mrf.mxu1  ;;  %v1287_v39 = vpop.f32.mrf.mxu0 }
 0x4a9   : > { %v1996_v46 = vpop.f32.mrf.mxu1  ;;  %v2002_v47 = vpop.f32.mrf.mxu0 }
 0x4ab   : > { %v1244_v48 = vpop.f32.mrf.mxu1  ;;  %v1290_v49 = vpop.f32.mrf.mxu0 }
 0x4ad   : > { %v1997_v50 = vpop.f32.mrf.mxu1  ;;  %v2003_v51 = vpop.f32.mrf.mxu0 }
 0x4cf   : > { %v1333_v52 = vpop.f32.mrf.mxu1 }
 0x4d0   : > { %v1385_v53 = vcombine.low %v1241_v38, %v1333_v52  ;;  %v1386_v54 = vcombine.high %v1241_v38, %v1333_v52 }
 0x4d1   : > { %v2008_v55 = vpop.f32.mrf.mxu1 }
 0x4d2   : > { %v1379_v56 = vpop.f32.mrf.mxu0  ;;  %v1393_v61 = vrot.slane %v1385_v53, %v2241_v24  ;;  %v1400_v62 = vrot.slane %v1386_v54, %v2241_v24 }
 0x4d3   : > { %v1336_v57 = vpop.f32.mrf.mxu1  ;;  %v1401_v58 = vcombine.low %v1287_v39, %v1379_v56  ;;  %v1402_v59 = vcombine.high %v1287_v39, %v1379_v56  ;;  %v2069_v56 = vld [vmem:[%s2453_s7] sm:$0xff]  }
 0x4d4   : > { %v2014_v60 = vpop.f32.mrf.mxu0  ;;  %2027 = vmatpush3.bf16.msra.mxu0 %v2069_v56 }
 0x4d5   : > { %v1409_v63 = vrot.slane %v1401_v58, %v2241_v24  ;;  %v1416_v0 = vrot.slane %v1402_v59, %v2241_v24  ;;  %v2009_v2 = vpop.f32.mrf.mxu1 }
 0x4d6   : > { %v1382_v4 = vpop.f32.mrf.mxu0 }
 0x4d7   : > { %v1417_v5 = vcombine.low %v1393_v61, %v1409_v63  ;;  %v1418_v7 = vcombine.high %v1393_v61, %v1409_v63  ;;  %v1433_v8 = vcombine.low %v1400_v62, %v1416_v0  ;;  %v1434_v9 = vcombine.high %v1400_v62, %v1416_v0  ;;  %v1914_v61 = vld [vmem:[%s2451_s5] ss:$0 sm:$0xff] }
 0x4d8   : > { %v2015_v13 = vpop.f32.mrf.mxu0  ;;  %v1915_v63 = vld [vmem:[%s2452_s6] ss:$0 sm:$0xff] }
 0x4d9   : > { %v1425_v15 = vrot.slane %v1417_v5, %v2243_v31  ;;  %v1432_v16 = vrot.slane %v1418_v7, %v2243_v31  ;;  %v1441_v17 = vrot.slane %v1433_v8, %v2243_v31  ;;  %v1448_v18 = vrot.slane %v1434_v9, %v2243_v31  ;;  %v2070_v5 = vld [vmem:[%s2455_s9 + $0x18] sm:$0xff]   ;;  %v2071_v7 = vld [vmem:[%s2455_s9 + $0x10] sm:$0xff]   ;;  %v2072_v8 = vld [vmem:[%s2455_s9 + $0x8] sm:$0xff]  }
 0x4da   : > { %v2073_v9 = vld [vmem:[%s2455_s9] sm:$0xff]  }
 0x4db   : > { %v1453_v19 = vcombine.low %v1425_v15, %v1432_v16  ;;  %v1908_v20 = vcombine.high %v1425_v15, %v1432_v16  ;;  %v1469_v21 = vcombine.low %v1441_v17, %v1448_v18  ;;  %v1909_v22 = vcombine.high %v1441_v17, %v1448_v18  ;;  %v1916_v13 = vld [vmem:[%s2454_s8] ss:$0 sm:$0xff] }
 0x4dd   : > { %v1460_v23 = vrot.slane %v1453_v19, %v2241_v24  ;;  %v1468_v25 = vrot.slane %v1908_v20, %v2241_v24  ;;  %v1476_v26 = vrot.slane %v1469_v21, %v2241_v24  ;;  %v1484_v27 = vrot.slane %v1909_v22, %v2241_v24 }
 0x4df   : > { %v1486_v30 = vcombine.high %v1460_v23, %v1468_v25  ;;  %v1502_v32 = vcombine.high %v1476_v26, %v1484_v27  ;;  %v1485_v6 = vcombine.low %v1460_v23, %v1468_v25  ;;  %v1501_v33 = vcombine.low %v1476_v26, %v1484_v27 }
 0x4e1   : > { %v1500_v34 = vrot.slane %v1486_v30, %v2243_v31  ;;  %v1516_v35 = vrot.slane %v1502_v32, %v2243_v31  ;;  %v1493_v36 = vrot.slane %v1485_v6, %v2243_v31  ;;  %v1509_v37 = vrot.slane %v1501_v33, %v2243_v31  ;;  %v1920_v32 = vld [vmem:[%s2456_s10] ss:$0 sm:$0xff] }
 0x4e3   : > { %v1519_v28 = vcombine.low %v1500_v34, %v1516_v35  ;;  %v1518_v29 = vcombine.high %v1493_v36, %v1509_v37  ;;  %v1517_v40 = vcombine.low %v1493_v36, %v1509_v37  ;;  %v1520_v24 = vcombine.high %v1500_v34, %v1516_v35 }
 0x4e5   : > { %1526 = vrot.lane.b32.xlu1 %v1519_v28, %s2113_s15  ;;  %1522 = vrot.lane.b32.xlu0 %v1518_v29, %s2114_s16 }
 0x4e9   : > { %1530 = vrot.lane.b32.xlu0 %v1520_v24, %s2115_s17 }
 0x557   : > { %v1523_v11 = vpop.permute.xlu0 %1522  ;;  %v1527_v10 = vpop.permute.xlu1 %1526 }
 0x558   : > { %v1533_v12 = vsel %vm967_vm2, %v1517_v40, %v1523_v11 }
 0x559   : > { %v1535_v42 = vsel %vm1534_vm4, %v1533_v12, %v1527_v10 }
 0x55b   : > { %v1531_v41 = vpop.permute.xlu0 %1530 }
 0x55c   : > { %v1537_v43 = vsel %vm1536_vm5, %v1535_v42, %v1531_v41 }
 0x55d   : > { %v1538_v31 = vpack.c.bf16 %v1537_v43, %v1537_v43 }
 0x55f   : > { %2021 = vmatmul.mubr.msk.bf16.vlgmr.msra.gmra.mxu1 %vm461_vm1, %v1538_v31  ;;  %v1926_v31 = vld [vmem:[%s2457_s11] ss:$0 sm:$0xff] }
 0x560   : > { %2040 = vmatprep.mubr.msk.bf16.mxu1 %vm2105_vm0, %v2104_v1  ;;  %2033 = vmatpush3.bf16.msra.mxu1 %v2070_v5 }
 0x561   : > { %2034 = vmatprep.subr.bf16.mxu1 %v2104_v1 }
 0x564   : > { %2035 = vmatpush3.bf16.msra.mxu1 %v2071_v7 }
 0x565   : > { %2036 = vmatprep.subr.bf16.mxu1 %v2104_v1 }
 0x568   : > { %2037 = vmatpush3.bf16.msra.mxu1 %v2072_v8 }
 0x569   : > { %2038 = vmatprep.subr.bf16.mxu1 %v2104_v1 }
 0x56c   : > { %2039 = vmatpush3.bf16.msra.mxu1 %v2073_v9 }
 0x61f   : > { %v1599_v38 = vpop.f32.mrf.mxu1 }
 0x620   : > { %v1600_v39 = vadd.f32 %v1910_v44, %v1599_v38 }
 0x621   : > { %v2022_v46 = vpop.f32.mrf.mxu1 }
 0x622   : > { %v1606_v47 = vadd.f32 %v1605_v45, %v1600_v39  ;;  %v1927_v45 = vld [vmem:[%s2458_s12] ss:$0 sm:$0xff] }
 0x623   : > { %v1602_v48 = vpop.f32.mrf.mxu1 }
 0x624   : > { %v1609_v49 = vsel %vm461_vm1, %v1606_v47, 0.0 }
 0x625   : > { %1610 = vadd.xlane.f32.xlu1 %v1609_v49  ;;  %v2023_v50 = vpop.f32.mrf.mxu1 }
 0x6ae   : > { %v1611_v51 = vpop.xlane.xlu1 %1610 }
 0x6af   : > { %v1613_v52 = vmul.f32 0.03125, %v1611_v51 }
 0x6b1   : > { %v1614_v53 = vsub.f32 %v1606_v47, %v1613_v52 }
 0x6b3   : > { %v1615_v54 = vmul.f32 %v1614_v53, %v1614_v53 }
 0x6b5   : > { %v1616_v55 = vsel %vm461_vm1, %v1615_v54, 0.0 }
 0x6b6   : > { %1617 = vadd.xlane.f32.xlu0 %v1616_v55 }
 0x73f   : > { %v1618_v57 = vpop.xlane.xlu0 %1617 }
 0x740   : > { %v1619_v58 = vmul.f32 0.03125, %v1618_v57 }
 0x742   : > { %v1620_v59 = vadd.f32 1e-12, %v1619_v58 }
 0x744   : > { %2090 = vrsqrt.f32 %v1620_v59 }
 0x751   : > { %v2091_v60 = vpop.eup %2090 }
 0x752   : > { %v1622_v62 = vmul.f32 %v2091_v60, %v1614_v53 }
 0x754   : > { %v1629_v0 = vmul.f32 %v1914_v61, %v1622_v62 }
 0x756   : > { %v1636_v2 = vadd.f32 %v1915_v63, %v1629_v0 }
 0x758   : > { %v1637_v4 = vpack.c.bf16 %v1636_v2, %v1636_v2 }
 0x75a   : > { %2029 = vmatmul.mubr.msk.bf16.vlgmr.msra.gmra.mxu0 %vm461_vm1, %v1637_v4 }
 0x81a   : > { %v1698_v14 = vpop.f32.mrf.mxu0 }
 0x81b   : > { %v1699_v15 = vadd.f32 %v1916_v13, %v1698_v14 }
 0x81c   : > { %v2030_v16 = vpop.f32.mrf.mxu0 }
 0x81d   : > { %v1704_v17 = vmul.f32 %v1699_v15, %v1699_v15 }
 0x81e   : > { %v1701_v18 = vpop.f32.mrf.mxu0 }
 0x81f   : > { %v1705_v19 = vmul.f32 %v1704_v17, %v1699_v15 }
 0x820   : > { %v2031_v20 = vpop.f32.mrf.mxu0 }
 0x821   : > { %v1706_v21 = vmul.f32 0.044715, %v1705_v19 }
 0x823   : > { %v1707_v22 = vadd.f32 %v1706_v21, %v1699_v15 }
 0x825   : > { %v1708_v23 = vmul.f32 0.7978846, %v1707_v22 }
 0x827   : > { %2092 = vtanh.f32 %v1708_v23 }
 0x834   : > { %v2093_v1 = vpop.eup %2092 }
 0x835   : > { %v1710_v25 = vadd.f32 1.0, %v2093_v1 }
 0x837   : > { %v1711_v26 = vmul.f32 0.5, %v1710_v25 }
 0x839   : > { %v1712_v27 = vmul.f32 %v1711_v26, %v1699_v15 }
 0x83b   : > { %v1713_v30 = vpack.c.bf16 %v1712_v27, %v1712_v27 }
 0x83d   : > { %2041 = vmatmul.mubr.msk.bf16.vlgmr.msra.gmra.mxu1 %vm1753_vm6, %v1713_v30 }
 0x8fd   : > { %v1791_v6 = vpop.f32.mrf.mxu1 }
 0x8fe   : > { %v1792_v33 = vadd.f32 %v1920_v32, %v1791_v6 }
 0x8ff   : > { %v2042_v34 = vpop.f32.mrf.mxu1 }
 0x900   : > { %v1797_v35 = vadd.f32 %v1792_v33, %v1636_v2 }
 0x901   : > { %v1794_v36 = vpop.f32.mrf.mxu1 }
 0x902   : > { %v1800_v37 = vsel %vm461_vm1, %v1797_v35, 0.0 }
 0x903   : > { %1801 = vadd.xlane.f32.xlu0 %v1800_v37  ;;  %v2043_v28 = vpop.f32.mrf.mxu1 }
 0x98c   : > { %v1802_v29 = vpop.xlane.xlu0 %1801 }
 0x98d   : > { %v1803_v40 = vmul.f32 0.03125, %v1802_v29 }
 0x98f   : > { %v1804_v24 = vsub.f32 %v1797_v35, %v1803_v40 }
 0x991   : > { %v1805_v11 = vmul.f32 %v1804_v24, %v1804_v24 }
 0x993   : > { %v1806_v10 = vsel %vm461_vm1, %v1805_v11, 0.0 }
 0x994   : > { %1807 = vadd.xlane.f32.xlu1 %v1806_v10 }
 0xa1d   : > { %v1808_v12 = vpop.xlane.xlu1 %1807 }
 0xa1e   : > { %v1809_v41 = vmul.f32 0.03125, %v1808_v12 }
 0xa20   : > { %v1810_v42 = vadd.f32 1e-12, %v1809_v41 }
 0xa22   : > { %2094 = vrsqrt.f32 %v1810_v42 }
 0xa2f   : > { %v2095_v43 = vpop.eup %2094 }
 0xa30   : > { %v1812_v44 = vmul.f32 %v2095_v43, %v1804_v24 }
 0xa32   : > { %v1819_v38 = vmul.f32 %v1926_v31, %v1812_v44 }
 0xa34   : > { %v1826_v39 = vadd.f32 %v1927_v45, %v1819_v38 }
 0xa36   : > { %v1827_v46 = vpack.c.bf16 %v1826_v39, %v1826_v39 }
 0xa38   : > { %1829 = vst.msk [vmem:[%s435_s18] sm:$0xf] %vm1828_vm7, %v1827_v46 }
 0xa39 PF: > { %s23_s25 = sadd.s32 1, %s2102_s25  }
 0xa3a   : > { %p20_p4 = scmp.ge.s32.totalorder %s23_s25, 4  }
 0xa3c   :  { %22 = sbr.rel (!%p20_p4) target bundleno = 1 (0x1), region = 102 }

// kernel: custom-call
= control target key start
LH: loop header
LB: loop body
LE: loop exit
PB: predicated region body
PF: predicated region fallthrough
CT: control target
= control target key end

     0   :  { %s6_s0 = inlined_call_operand.vmem [shape: f32[3,2,2], index: 0, kind: output, shape index: {}]  }

// kernel: closed_call.6
= control target key start
LH: loop header
LB: loop body
LE: loop exit
PB: predicated region body
PF: predicated region fallthrough
CT: control target
= control target key end

     0   :  { %s2186_s25 = smov 0   ;;  %s2446_s0 = inlined_call_operand.vmem [shape: bf16[2,8,32], index: 0, kind: input, shape index: {}]   ;;  %s2447_s1 = inlined_call_operand.vmem [shape: bf16[32,96], index: 1, kind: input, shape index: {}]   ;;  %s2448_s2 = inlined_call_operand.vmem [shape: f32[1,96], index: 2, kind: input, shape index: {}]   ;;  %s2449_s3 = inlined_call_operand.vmem [shape: bf16[32,32], index: 3, kind: input, shape index: {}]   ;;  %s2450_s4 = inlined_call_operand.vmem [shape: f32[1,32], index: 4, kind: input, shape index: {}]   ;;  %s2451_s5 = inlined_call_operand.vmem [shape: f32[1,32], index: 5, kind: input, shape index: {}]   ;;  %s2452_s6 = inlined_call_operand.vmem [shape: f32[1,32], index: 6, kind: input, shape index: {}]   ;;  %s2453_s7 = inlined_call_operand.vmem [shape: bf16[32,64], index: 7, kind: input, shape index: {}]   ;;  %s2454_s8 = inlined_call_operand.vmem [shape: f32[1,64], index: 8, kind: input, shape index: {}]   ;;  %s2455_s9 = inlined_call_operand.vmem [shape: bf16[64,32], index: 9, kind: input, shape index: {}]   ;;  %s2456_s10 = inlined_call_operand.vmem [shape: f32[1,32], index: 10, kind: input, shape index: {}]   ;;  %s2457_s11 = inlined_call_operand.vmem [shape: f32[1,32], index: 11, kind: input, shape index: {}]   ;;  %s2458_s12 = inlined_call_operand.vmem [shape: f32[1,32], index: 12, kind: input, shape index: {}]   ;;  %s2459_s13 = inlined_call_operand.vmem [shape: bf16[2,8,32], index: 13, kind: output, shape index: {}]  }
   0x1 LB: > { %s1883_s26 = sadd.s32 4294967295, %s2102_s25   ;;  %p1887_p0 = scmp.ge.s32.totalorder %s2102_s25, 1  ;;  %s2102_s25 = sphi %s2186_s25, %s23_s25  }
   0x2   : > { %p386_p1 = scmp.lt.s32.totalorder %s2102_s25, 3 }
   0x4   : > { %p387_p2 = pnand %p1887_p0, %p386_p1 }
   0x5   : > { %p428_p3 = scmp.lt.s32.totalorder (!%p387_p2), %s1883_s26, 1  ;;  %s2106_s20 = smov (!%p387_p2), 104  }
   0x6   : > { %390 = sbr.rel (%p387_p2) target bundleno = 2617 (0xa39), region = 72  ;;  %s2107_s21 = smov (!%p387_p2), 120  }
   0x7   : > { %s2108_s22 = smov (!%p387_p2), 96   ;;  %s2109_s23 = smov (!%p387_p2), 112  }
   0x8   : > { %s2112_s24 = smov (!%p387_p2), 64   ;;  %s2113_s15 = smov (!%p387_p2), 16  }
   0x9   : > { %s2114_s16 = smov (!%p387_p2), 8  }
   0xb   : > { %v2064_v0 = vld [vmem:[%s2447_s1 + $0x8] sm:$0xff]   ;;  %v2104_v1 = vmov 0.0   ;;  %v2065_v2 = vld [vmem:[%s2447_s1] sm:$0xff]   ;;  %vm2105_vm0 = vmmov 0   ;;  %s2461_s26 = smov (!%p428_p3, %s1883_s26), 1  ;;  %vm461_vm1 = vcmask 261120   ;;  %v521_v16 = vlaneseq }
   0xc   : > { %1960 = vmatprep.subr.bf16.mxu0 %v2104_v1  ;;  %1968 = vmatprep.subr.bf16.mxu1 %v2104_v1  ;;  %s1888_s14 = sshll.u32 %s2461_s26, 2  ;;  %v1890_v4 = vld [vmem:[%s2448_s2] ss:$0 sm:$0xff]  ;;  %v2110_v14 = vmov 1983009808   ;;  %vm967_vm2 = vcmask 64512  }
   0xd   : > { %1961 = vmatpush3.bf16.msra.mxu0 %v2064_v0  ;;  %1964 = vmatprep.mubr.msk.bf16.mxu0 %vm2105_vm0, %v2104_v1  ;;  %s431_s17 = scalar_lea.vmem %s2446_s0, %s1888_s14  ;;  %v519_v15 = vunpack.c.l.s4 %v2110_v14  ;;  %v2111_v17 = vmov 1934713408   ;;  %v522_v20 = vshrl.u32 %v521_v16, 7  ;;  %vm1203_vm3 = vcmask 1043456   ;;  %s435_s18 = scalar_lea.vmem %s2459_s13, %s1888_s14 }
   0xe   : > { %1962 = vmatprep.subr.bf16.mxu0 %v2104_v1  ;;  %1970 = vmatprep.mubr.msk.bf16.mxu1 %vm2105_vm0, %v2104_v1  ;;  %v2216_v3 = vld [vmem:[%s431_s17] sm:$0xf]  ;;  %v551_v18 = vunpack.c.l.s4 %v2111_v17  ;;  %s2115_s17 = smov 24   ;;  %vm1534_vm4 = vcmask 130048   ;;  %vm1536_vm5 = vcmask 195584   ;;  %vm1753_vm6 = vcmask 523264  }
   0xf   : > { %v520_v19 = vunpack.c.0.s8 %v519_v15  ;;  %vm1828_vm7 = vcmask 257024  }
  0x10   : > { %v552_v23 = vunpack.c.0.s8 %v551_v18 }
  0x11   : > { %1963 = vmatpush3.bf16.msra.mxu0 %v2065_v2  ;;  %v2241_v24 = vsub.s32 %v520_v19, %v522_v20 }
  0x12   : > { %1974 = vmatprep.subr.bf16.mxu0 %v2104_v1  ;;  %v2243_v31 = vsub.s32 %v552_v23, %v522_v20 }
  0x14   : > { %1965 = vmatmul.mubr.msk.bf16.vlgmr.msra.gmra.mxu0 %vm461_vm1, %v2216_v3 }
  0x15   : > { %1976 = vmatprep.mubr.msk.bf16.mxu0 %vm2105_vm0, %v2104_v1 }
  0xd4   : > { %v499_v5 = vpop.f32.mrf.mxu0 }
  0xd5   : > { %v2225_v6 = vadd.f32 %v1890_v4, %v499_v5 }
  0xd6   : > { %v1966_v7 = vpop.f32.mrf.mxu0 }
  0xd7   : > { %661 = vrot.lane.b32.xlu1 %v2225_v6, %s2106_s20  ;;  %657 = vrot.lane.b32.xlu0 %v2225_v6, %s2107_s21  ;;  %v505_v13 = vmul.f32 0.35355338, %v2225_v6 }
  0xd8   : > { %v502_v8 = vpop.f32.mrf.mxu0 }
  0xda   : > { %v1967_v9 = vpop.f32.mrf.mxu0 }
  0xdb   : > { %663 = vrot.lane.b32.xlu1 %v2225_v6, %s2108_s22  ;;  %659 = vrot.lane.b32.xlu0 %v2225_v6, %s2109_s23 }
 0x149   : > { %v2231_v10 = vpop.permute.xlu0 %657  ;;  %v2234_v11 = vpop.permute.xlu1 %661 }
 0x14a   : > { %665 = vrot.lane.b32.xlu0 %v2231_v10, %s2108_s22 }
 0x14d   : > { %v2236_v12 = vpop.permute.xlu0 %659  ;;  %v664_v21 = vpop.permute.xlu1 %663 }
 0x14e   : > { %669 = vrot.lane.b32.xlu0 %v2234_v11, %s2108_s22  ;;  %667 = vrot.lane.b32.xlu1 %v2236_v12, %s2108_s22 }
 0x152   : > { %510 = vrot.lane.b32.xlu0 %v505_v13, %s2109_s23  ;;  %507 = vrot.lane.b32.xlu1 %v505_v13, %s2107_s21 }
 0x156   : > { %513 = vrot.lane.b32.xlu1 %v505_v13, %s2106_s20 }
 0x1bc   : > { %v666_v22 = vpop.permute.xlu0 %665 }
 0x1c0   : > { %v668_v25 = vpop.permute.xlu1 %667  ;;  %v670_v26 = vpop.permute.xlu0 %669 }
 0x1c1   : > { %v675_v27 = vcombine.low %v664_v21, %v668_v25  ;;  %v676_v28 = vcombine.high %v664_v21, %v668_v25  ;;  %v691_v29 = vcombine.low %v666_v22, %v670_v26  ;;  %v692_v30 = vcombine.high %v666_v22, %v670_v26 }
 0x1c3   : > { %v683_v32 = vrot.slane %v675_v27, %v2241_v24  ;;  %v690_v33 = vrot.slane %v676_v28, %v2241_v24  ;;  %v699_v34 = vrot.slane %v691_v29, %v2241_v24  ;;  %v706_v35 = vrot.slane %v692_v30, %v2241_v24 }
 0x1c4   : > { %v508_v36 = vpop.permute.xlu1 %507  ;;  %v511_v41 = vpop.permute.xlu0 %510 }
 0x1c5   : > { %v707_v37 = vcombine.low %v683_v32, %v699_v34  ;;  %v708_v38 = vcombine.high %v683_v32, %v699_v34  ;;  %v723_v39 = vcombine.low %v690_v33, %v706_v35  ;;  %v724_v40 = vcombine.high %v690_v33, %v706_v35 }
 0x1c6   : > { %v516_v46 = vcombine.low %v505_v13, %v511_v41  ;;  %v517_v47 = vcombine.high %v505_v13, %v511_v41 }
 0x1c7   : > { %v715_v42 = vrot.slane %v707_v37, %v2243_v31  ;;  %v722_v43 = vrot.slane %v708_v38, %v2243_v31  ;;  %v731_v44 = vrot.slane %v723_v39, %v2243_v31  ;;  %v738_v45 = vrot.slane %v724_v40, %v2243_v31 }
 0x1c8   : > { %v514_v48 = vpop.permute.xlu1 %513  ;;  %v524_v59 = vrot.slane %v516_v46, %v2241_v24  ;;  %v531_v60 = vrot.slane %v517_v47, %v2241_v24 }
 0x1c9   : > { %v743_v49 = vcombine.low %v715_v42, %v722_v43  ;;  %v1896_v50 = vcombine.high %v715_v42, %v722_v43  ;;  %v759_v51 = vcombine.low %v731_v44, %v738_v45  ;;  %v1897_v52 = vcombine.high %v731_v44, %v738_v45 }
 0x1ca   : > { %v532_v53 = vcombine.low %v508_v36, %v514_v48  ;;  %v533_v54 = vcombine.high %v508_v36, %v514_v48 }
 0x1cb   : > { %v750_v55 = vrot.slane %v743_v49, %v2241_v24  ;;  %v758_v56 = vrot.slane %v1896_v50, %v2241_v24  ;;  %v766_v57 = vrot.slane %v759_v51, %v2241_v24  ;;  %v774_v58 = vrot.slane %v1897_v52, %v2241_v24 }
 0x1cc   : > { %v540_v61 = vrot.slane %v532_v53, %v2241_v24  ;;  %v547_v62 = vrot.slane %v533_v54, %v2241_v24 }
 0x1cd   : > { %v775_v63 = vcombine.low %v750_v55, %v758_v56  ;;  %v791_v0 = vcombine.low %v766_v57, %v774_v58  ;;  %v776_v13 = vcombine.high %v750_v55, %v758_v56  ;;  %v792_v14 = vcombine.high %v766_v57, %v774_v58 }
 0x1ce   : > { %v548_v2 = vcombine.low %v524_v59, %v540_v61  ;;  %v549_v4 = vcombine.high %v524_v59, %v540_v61  ;;  %v564_v5 = vcombine.low %v531_v60, %v547_v62  ;;  %v565_v7 = vcombine.high %v531_v60, %v547_v62 }
 0x1cf   : > { %v783_v8 = vrot.slane %v775_v63, %v2243_v31  ;;  %v799_v9 = vrot.slane %v791_v0, %v2243_v31  ;;  %v790_v28 = vrot.slane %v776_v13, %v2243_v31  ;;  %v806_v29 = vrot.slane %v792_v14, %v2243_v31 }
 0x1d0   : > { %v556_v15 = vrot.slane %v548_v2, %v2243_v31  ;;  %v563_v16 = vrot.slane %v549_v4, %v2243_v31  ;;  %v572_v17 = vrot.slane %v564_v5, %v2243_v31  ;;  %v579_v18 = vrot.slane %v565_v7, %v2243_v31 }
 0x1d1   : > { %v807_v19 = vcombine.low %v783_v8, %v799_v9  ;;  %v808_v20 = vcombine.high %v783_v8, %v799_v9  ;;  %v809_v39 = vcombine.low %v790_v28, %v806_v29  ;;  %v810_v40 = vcombine.high %v790_v28, %v806_v29 }
 0x1d2   : > { %v584_v21 = vcombine.low %v556_v15, %v563_v16  ;;  %v1894_v22 = vcombine.high %v556_v15, %v563_v16  ;;  %v600_v23 = vcombine.low %v572_v17, %v579_v18  ;;  %v1895_v25 = vcombine.high %v572_v17, %v579_v18 }
 0x1d3   : > { %v811_v26 = vpack.c.bf16 %v807_v19, %v807_v19  ;;  %v812_v27 = vpack.c.bf16 %v808_v20, %v808_v20  ;;  %v813_v47 = vpack.c.bf16 %v809_v39, %v809_v39  ;;  %v814_v48 = vpack.c.bf16 %v810_v40, %v810_v40 }
 0x1d4   : > { %v591_v30 = vrot.slane %v584_v21, %v2241_v24  ;;  %v599_v32 = vrot.slane %v1894_v22, %v2241_v24  ;;  %v607_v33 = vrot.slane %v600_v23, %v2241_v24  ;;  %v615_v34 = vrot.slane %v1895_v25, %v2241_v24 }
 0x1d5   : > { %v972_v35 = vsel %vm967_vm2, %v811_v26, 0  ;;  %v1018_v36 = vsel %vm967_vm2, %v812_v27, 0  ;;  %v1064_v53 = vsel %vm967_vm2, %v813_v47, 0  ;;  %v1110_v54 = vsel %vm967_vm2, %v814_v48, 0 }
 0x1d6   : > { %1969 = vmatpush3.bf16.xpose.msra.mxu1 %v972_v35  ;;  %1975 = vmatpush3.bf16.xpose.msra.mxu0 %v1018_v36  ;;  %v616_v37 = vcombine.low %v591_v30, %v599_v32  ;;  %v632_v38 = vcombine.low %v607_v33, %v615_v34  ;;  %v617_v42 = vcombine.high %v591_v30, %v599_v32 }
 0x1d7   : > { %1980 = vmatprep.subr.bf16.mxu1 %v2104_v1  ;;  %1986 = vmatprep.subr.bf16.mxu0 %v2104_v1  ;;  %v633_v43 = vcombine.high %v607_v33, %v615_v34 }
 0x1d8   : > { %v624_v41 = vrot.slane %v616_v37, %v2243_v31  ;;  %v640_v44 = vrot.slane %v632_v38, %v2243_v31  ;;  %v631_v51 = vrot.slane %v617_v42, %v2243_v31 }
 0x1d9   : > { %v647_v52 = vrot.slane %v633_v43, %v2243_v31 }
 0x1da   : > { %v648_v45 = vcombine.low %v624_v41, %v640_v44  ;;  %v649_v46 = vcombine.high %v624_v41, %v640_v44 }
 0x1db   : > { %v650_v55 = vcombine.low %v631_v51, %v647_v52  ;;  %v651_v56 = vcombine.high %v631_v51, %v647_v52 }
 0x1dc   : > { %v652_v49 = vpack.c.bf16 %v648_v45, %v648_v45  ;;  %v653_v50 = vpack.c.bf16 %v649_v46, %v649_v46 }
 0x1dd   : > { %v654_v57 = vpack.c.bf16 %v650_v55, %v650_v55  ;;  %v655_v58 = vpack.c.bf16 %v651_v56, %v651_v56 }
 0x1de   : > { %1971 = vmatmul.mubr.msk.bf16.vlgmr.msra.gmra.mxu1 %vm967_vm2, %v652_v49  ;;  %1977 = vmatmul.mubr.msk.bf16.vlgmr.msra.gmra.mxu0 %vm967_vm2, %v653_v50 }
 0x1df   : > { %1981 = vmatpush3.bf16.xpose.msra.mxu1 %v1064_v53  ;;  %1987 = vmatpush3.bf16.xpose.msra.mxu0 %v1110_v54 }
 0x1e0   : > { %1982 = vmatprep.mubr.msk.bf16.mxu1 %vm2105_vm0, %v2104_v1  ;;  %1988 = vmatprep.mubr.msk.bf16.mxu0 %vm2105_vm0, %v2104_v1 }
 0x1e1   : > { %1992 = vmatprep.subr.bf16.mxu1 %v2104_v1  ;;  %1998 = vmatprep.subr.bf16.mxu0 %v2104_v1 }
 0x1e6   : > { %1983 = vmatmul.mubr.msk.bf16.vlgmr.msra.gmra.mxu1 %vm967_vm2, %v654_v57  ;;  %1989 = vmatmul.mubr.msk.bf16.vlgmr.msra.gmra.mxu0 %vm967_vm2, %v655_v58 }
 0x1e7   : > { %1994 = vmatprep.mubr.msk.bf16.mxu1 %vm2105_vm0, %v2104_v1  ;;  %2000 = vmatprep.mubr.msk.bf16.mxu0 %vm2105_vm0, %v2104_v1 }
 0x29e   : > { %v1008_v59 = vpop.f32.mrf.mxu1  ;;  %v1054_v60 = vpop.f32.mrf.mxu0 }
 0x29f   : > { %v1152_v61 = vsel %vm967_vm2, %v1008_v59, -inf  ;;  %v1155_v62 = vsel %vm967_vm2, %v1054_v60, -inf }
 0x2a0   : > { %1153 = vmax.xlane.f32.xlu0 %v1152_v61  ;;  %v1972_v63 = vpop.f32.mrf.mxu1  ;;  %1156 = vmax.xlane.f32.xlu1 %v1155_v62  ;;  %v1978_v0 = vpop.f32.mrf.mxu0 }
 0x2a2   : > { %v1011_v2 = vpop.f32.mrf.mxu1  ;;  %v1057_v4 = vpop.f32.mrf.mxu0 }
 0x2a4   : > { %v1973_v5 = vpop.f32.mrf.mxu1  ;;  %v1979_v7 = vpop.f32.mrf.mxu0 }
 0x2a6   : > { %v1100_v8 = vpop.f32.mrf.mxu1  ;;  %v1146_v9 = vpop.f32.mrf.mxu0 }
 0x2a7   : > { %v1158_v13 = vsel %vm967_vm2, %v1100_v8, -inf  ;;  %v1161_v18 = vsel %vm967_vm2, %v1146_v9, -inf }
 0x2a8   : > { %1159 = vmax.xlane.f32.xlu0 %v1158_v13  ;;  %v1984_v14 = vpop.f32.mrf.mxu1  ;;  %v1990_v15 = vpop.f32.mrf.mxu0 }
 0x2aa   : > { %v1103_v16 = vpop.f32.mrf.mxu1  ;;  %v1149_v17 = vpop.f32.mrf.mxu0 }
 0x2ac   : > { %v1985_v19 = vpop.f32.mrf.mxu1  ;;  %1162 = vmax.xlane.f32.xlu0 %v1161_v18  ;;  %v1991_v20 = vpop.f32.mrf.mxu0 }
 0x2b1   : > { %815 = vrot.lane.b32.xlu1 %v2225_v6, %s2112_s24 }
 0x329   : > { %v1154_v21 = vpop.xlane.xlu0 %1153  ;;  %v1157_v22 = vpop.xlane.xlu1 %1156 }
 0x32a   : > { %v1164_v23 = vsub.f32 %v1008_v59, %v1154_v21  ;;  %v1165_v25 = vsub.f32 %v1054_v60, %v1157_v22 }
 0x32c   : > { %v1168_v26 = vmul.f32 1.442695, %v1164_v23  ;;  %v1170_v27 = vmul.f32 1.442695, %v1165_v25 }
 0x32e   : > { %2074 = vpow2.f32 %v1168_v26 }
 0x32f   : > { %2076 = vpow2.f32 %v1170_v27 }
 0x331   : > { %v1160_v6 = vpop.xlane.xlu0 %1159 }
 0x332   : > { %v1166_v33 = vsub.f32 %v1100_v8, %v1160_v6 }
 0x334   : > { %v1172_v36 = vmul.f32 1.442695, %v1166_v33 }
 0x335   : > { %v1163_v34 = vpop.xlane.xlu0 %1162 }
 0x336   : > { %v1167_v35 = vsub.f32 %v1146_v9, %v1163_v34  ;;  %2078 = vpow2.f32 %v1172_v36 }
 0x338   : > { %v1174_v37 = vmul.f32 1.442695, %v1167_v35 }
 0x33a   : > { %2080 = vpow2.f32 %v1174_v37 }
 0x33b   : > { %v2302_v28 = vpop.eup %2074 }
 0x33c   : > { %v2304_v29 = vpop.eup %2076  ;;  %v1176_v30 = vsel %vm967_vm2, %v2302_v28, 0.0 }
 0x33d   : > { %1177 = vadd.xlane.f32.xlu1 %v1176_v30  ;;  %v1179_v32 = vsel %vm967_vm2, %v2304_v29, 0.0 }
 0x33e   : > { %1180 = vadd.xlane.f32.xlu0 %v1179_v32 }
 0x343   : > { %v2313_v38 = vpop.eup %2078 }
 0x344   : > { %v1182_v40 = vsel %vm967_vm2, %v2313_v38, 0.0 }
 0x347   : > { %v2315_v39 = vpop.eup %2080 }
 0x34e   : > { %819 = vrot.lane.b32.xlu1 %v2236_v12, %s2112_s24 }
 0x352   : > { %821 = vrot.lane.b32.xlu1 %v2234_v11, %s2112_s24  ;;  %v1185_v11 = vsel %vm967_vm2, %v2315_v39, 0.0 }
 0x354   : > { %817 = vrot.lane.b32.xlu0 %v2231_v10, %s2112_s24  ;;  %v816_v10 = vpop.permute.xlu1 %815 }
 0x373   : > { %1183 = vadd.xlane.f32.xlu0 %v1182_v40 }
 0x376   : > { %1186 = vadd.xlane.f32.xlu1 %v1185_v11 }
 0x3c6   : > { %v1178_v12 = vpop.xlane.xlu1 %1177 }
 0x3c7   : > { %v1181_v41 = vpop.xlane.xlu0 %1180  ;;  %2082 = vrcp.f32 %v1178_v12 }
 0x3c8   : > { %2084 = vrcp.f32 %v1181_v41 }
 0x3ca   : > { %v820_v42 = vpop.permute.xlu1 %819 }
 0x3cb   : > { %v827_v43 = vcombine.low %v816_v10, %v820_v42  ;;  %v828_v44 = vcombine.high %v816_v10, %v820_v42  ;;  %v818_v45 = vpop.permute.xlu0 %817 }
 0x3cd   : > { %v835_v49 = vrot.slane %v827_v43, %v2241_v24  ;;  %v842_v50 = vrot.slane %v828_v44, %v2241_v24 }
 0x3ce   : > { %v822_v46 = vpop.permute.xlu1 %821 }
 0x3cf   : > { %v843_v47 = vcombine.low %v818_v45, %v822_v46  ;;  %v844_v48 = vcombine.high %v818_v45, %v822_v46  ;;  %v2066_v45 = vld [vmem:[%s2449_s3 + $0x8] sm:$0xff]  }
 0x3d1   : > { %v851_v51 = vrot.slane %v843_v47, %v2241_v24  ;;  %v858_v52 = vrot.slane %v844_v48, %v2241_v24 }
 0x3d3   : > { %v859_v53 = vcombine.low %v835_v49, %v851_v51  ;;  %v860_v54 = vcombine.high %v835_v49, %v851_v51  ;;  %v875_v55 = vcombine.low %v842_v50, %v858_v52  ;;  %v876_v56 = vcombine.high %v842_v50, %v858_v52 }
 0x3d4   : > { %v2083_v15 = vpop.eup %2082 }
 0x3d5   : > { %v867_v57 = vrot.slane %v859_v53, %v2243_v31  ;;  %v874_v58 = vrot.slane %v860_v54, %v2243_v31  ;;  %v883_v59 = vrot.slane %v875_v55, %v2243_v31  ;;  %v890_v60 = vrot.slane %v876_v56, %v2243_v31  ;;  %v2085_v16 = vpop.eup %2084 }
 0x3d6   : > { %v1189_v30 = vmul.f32 %v2083_v15, %v2302_v28  ;;  %v1191_v32 = vmul.f32 %v2085_v16, %v2304_v29 }
 0x3d7   : > { %v895_v61 = vcombine.low %v867_v57, %v874_v58  ;;  %v1898_v62 = vcombine.high %v867_v57, %v874_v58  ;;  %v911_v63 = vcombine.low %v883_v59, %v890_v60  ;;  %v1899_v0 = vcombine.high %v883_v59, %v890_v60 }
 0x3d8   : > { %v1196_v36 = vpack.c.bf16 %v1189_v30, %v1189_v30  ;;  %v1197_v37 = vpack.c.bf16 %v1191_v32, %v1191_v32 }
 0x3d9   : > { %v902_v2 = vrot.slane %v895_v61, %v2241_v24  ;;  %v910_v4 = vrot.slane %v1898_v62, %v2241_v24  ;;  %v918_v5 = vrot.slane %v911_v63, %v2241_v24  ;;  %v926_v7 = vrot.slane %v1899_v0, %v2241_v24 }
 0x3db   : > { %v927_v8 = vcombine.low %v902_v2, %v910_v4  ;;  %v943_v9 = vcombine.low %v918_v5, %v926_v7  ;;  %v928_v13 = vcombine.high %v902_v2, %v910_v4  ;;  %v944_v14 = vcombine.high %v918_v5, %v926_v7 }
 0x3dd   : > { %v935_v17 = vrot.slane %v927_v8, %v2243_v31  ;;  %v951_v18 = vrot.slane %v943_v9, %v2243_v31  ;;  %v942_v19 = vrot.slane %v928_v13, %v2243_v31  ;;  %v958_v20 = vrot.slane %v944_v14, %v2243_v31  ;;  %v2067_v14 = vld [vmem:[%s2449_s3] sm:$0xff]  }
 0x3df   : > { %v959_v21 = vcombine.low %v935_v17, %v951_v18  ;;  %v960_v22 = vcombine.high %v935_v17, %v951_v18  ;;  %v961_v23 = vcombine.low %v942_v19, %v958_v20  ;;  %v962_v25 = vcombine.high %v942_v19, %v958_v20 }
 0x3e1   : > { %v963_v26 = vpack.c.bf16 %v959_v21, %v959_v21  ;;  %v964_v27 = vpack.c.bf16 %v960_v22, %v960_v22  ;;  %v965_v34 = vpack.c.bf16 %v961_v23, %v961_v23  ;;  %v966_v35 = vpack.c.bf16 %v962_v25, %v962_v25 }
 0x3e3   : > { %v1205_v6 = vsel %vm1203_vm3, %v963_v26, 0  ;;  %v1251_v33 = vsel %vm1203_vm3, %v964_v27, 0  ;;  %v1297_v28 = vsel %vm1203_vm3, %v965_v34, 0  ;;  %v1343_v29 = vsel %vm1203_vm3, %v966_v35, 0 }
 0x3e4   : > { %1993 = vmatpush3.bf16.msra.mxu1 %v1205_v6  ;;  %1999 = vmatpush3.bf16.msra.mxu0 %v1251_v33 }
 0x3e5   : > { %2004 = vmatprep.subr.bf16.mxu1 %v2104_v1  ;;  %2010 = vmatprep.subr.bf16.mxu0 %v2104_v1 }
 0x3e7   : > { %1995 = vmatmul.mubr.msk.bf16.vlgmr.msra.gmra.mxu1 %vm967_vm2, %v1196_v36  ;;  %2001 = vmatmul.mubr.msk.bf16.vlgmr.msra.gmra.mxu0 %vm967_vm2, %v1197_v37 }
 0x3e8   : > { %2005 = vmatpush3.bf16.msra.mxu1 %v1297_v28  ;;  %2011 = vmatpush3.bf16.msra.mxu0 %v1343_v29 }
 0x3e9   : > { %2006 = vmatprep.mubr.msk.bf16.mxu1 %vm2105_vm0, %v2104_v1  ;;  %2012 = vmatprep.mubr.msk.bf16.mxu0 %vm2105_vm0, %v2104_v1 }
 0x3ea   : > { %2016 = vmatprep.subr.bf16.mxu1 %v2104_v1  ;;  %2024 = vmatprep.subr.bf16.mxu0 %v2104_v1 }
 0x3fc   : > { %v1184_v40 = vpop.xlane.xlu0 %1183 }
 0x3fd   : > { %2086 = vrcp.f32 %v1184_v40 }
 0x3ff   : > { %v1187_v11 = vpop.xlane.xlu1 %1186 }
 0x400   : > { %2088 = vrcp.f32 %v1187_v11 }
 0x40a   : > { %v2087_v10 = vpop.eup %2086 }
 0x40b   : > { %v1193_v12 = vmul.f32 %v2087_v10, %v2313_v38 }
 0x40d   : > { %v2089_v41 = vpop.eup %2088  ;;  %v1198_v42 = vpack.c.bf16 %v1193_v12, %v1193_v12 }
 0x40e   : > { %v1195_v43 = vmul.f32 %v2089_v41, %v2315_v39 }
 0x40f   : > { %2007 = vmatmul.mubr.msk.bf16.vlgmr.msra.gmra.mxu1 %vm967_vm2, %v1198_v42 }
 0x410   : > { %v1199_v44 = vpack.c.bf16 %v1195_v43, %v1195_v43  ;;  %2020 = vmatprep.mubr.msk.bf16.mxu1 %vm2105_vm0, %v2104_v1  ;;  %2017 = vmatpush3.bf16.msra.mxu1 %v2066_v45  ;;  %v1605_v45 = vunpack.c.l.bf16 %v2216_v3  ;;  %v2068_v3 = vld [vmem:[%s2453_s7 + $0x8] sm:$0xff]  }
 0x411   : > { %2018 = vmatprep.subr.bf16.mxu1 %v2104_v1 }
 0x412   : > { %2013 = vmatmul.mubr.msk.bf16.vlgmr.msra.gmra.mxu0 %vm967_vm2, %v1199_v44  ;;  %v1910_v44 = vld [vmem:[%s2450_s4] ss:$0 sm:$0xff] }
 0x413   : > { %2028 = vmatprep.mubr.msk.bf16.mxu0 %vm2105_vm0, %v2104_v1  ;;  %2025 = vmatpush3.bf16.msra.mxu0 %v2068_v3 }
 0x414   : > { %2019 = vmatpush3.bf16.msra.mxu1 %v2067_v14  ;;  %2026 = vmatprep.subr.bf16.mxu0 %v2104_v1 }
 0x415   : > { %2032 = vmatprep.subr.bf16.mxu1 %v2104_v1 }
 0x4a7   : > { %v1241_v38 = vpop.f32.mrf.mxu1  ;;  %v1287_v39 = vpop.f32.mrf.mxu0 }
 0x4a9   : > { %v1996_v46 = vpop.f32.mrf.mxu1  ;;  %v2002_v47 = vpop.f32.mrf.mxu0 }
 0x4ab   : > { %v1244_v48 = vpop.f32.mrf.mxu1  ;;  %v1290_v49 = vpop.f32.mrf.mxu0 }
 0x4ad   : > { %v1997_v50 = vpop.f32.mrf.mxu1  ;;  %v2003_v51 = vpop.f32.mrf.mxu0 }
 0x4cf   : > { %v1333_v52 = vpop.f32.mrf.mxu1 }
 0x4d0   : > { %v1385_v53 = vcombine.low %v1241_v38, %v1333_v52  ;;  %v1386_v54 = vcombine.high %v1241_v38, %v1333_v52 }
 0x4d1   : > { %v2008_v55 = vpop.f32.mrf.mxu1 }
 0x4d2   : > { %v1379_v56 = vpop.f32.mrf.mxu0  ;;  %v1393_v61 = vrot.slane %v1385_v53, %v2241_v24  ;;  %v1400_v62 = vrot.slane %v1386_v54, %v2241_v24 }
 0x4d3   : > { %v1336_v57 = vpop.f32.mrf.mxu1  ;;  %v1401_v58 = vcombine.low %v1287_v39, %v1379_v56  ;;  %v1402_v59 = vcombine.high %v1287_v39, %v1379_v56  ;;  %v2069_v56 = vld [vmem:[%s2453_s7] sm:$0xff]  }
 0x4d4   : > { %v2014_v60 = vpop.f32.mrf.mxu0  ;;  %2027 = vmatpush3.bf16.msra.mxu0 %v2069_v56 }
 0x4d5   : > { %v1409_v63 = vrot.slane %v1401_v58, %v2241_v24  ;;  %v1416_v0 = vrot.slane %v1402_v59, %v2241_v24  ;;  %v2009_v2 = vpop.f32.mrf.mxu1 }
 0x4d6   : > { %v1382_v4 = vpop.f32.mrf.mxu0 }
 0x4d7   : > { %v1417_v5 = vcombine.low %v1393_v61, %v1409_v63  ;;  %v1418_v7 = vcombine.high %v1393_v61, %v1409_v63  ;;  %v1433_v8 = vcombine.low %v1400_v62, %v1416_v0  ;;  %v1434_v9 = vcombine.high %v1400_v62, %v1416_v0  ;;  %v1914_v61 = vld [vmem:[%s2451_s5] ss:$0 sm:$0xff] }
 0x4d8   : > { %v2015_v13 = vpop.f32.mrf.mxu0  ;;  %v1915_v63 = vld [vmem:[%s2452_s6] ss:$0 sm:$0xff] }
 0x4d9   : > { %v1425_v15 = vrot.slane %v1417_v5, %v2243_v31  ;;  %v1432_v16 = vrot.slane %v1418_v7, %v2243_v31  ;;  %v1441_v17 = vrot.slane %v1433_v8, %v2243_v31  ;;  %v1448_v18 = vrot.slane %v1434_v9, %v2243_v31  ;;  %v2070_v5 = vld [vmem:[%s2455_s9 + $0x18] sm:$0xff]   ;;  %v2071_v7 = vld [vmem:[%s2455_s9 + $0x10] sm:$0xff]   ;;  %v2072_v8 = vld [vmem:[%s2455_s9 + $0x8] sm:$0xff]  }
 0x4da   : > { %v2073_v9 = vld [vmem:[%s2455_s9] sm:$0xff]  }
 0x4db   : > { %v1453_v19 = vcombine.low %v1425_v15, %v1432_v16  ;;  %v1908_v20 = vcombine.high %v1425_v15, %v1432_v16  ;;  %v1469_v21 = vcombine.low %v1441_v17, %v1448_v18  ;;  %v1909_v22 = vcombine.high %v1441_v17, %v1448_v18  ;;  %v1916_v13 = vld [vmem:[%s2454_s8] ss:$0 sm:$0xff] }
 0x4dd   : > { %v1460_v23 = vrot.slane %v1453_v19, %v2241_v24  ;;  %v1468_v25 = vrot.slane %v1908_v20, %v2241_v24  ;;  %v1476_v26 = vrot.slane %v1469_v21, %v2241_v24  ;;  %v1484_v27 = vrot.slane %v1909_v22, %v2241_v24 }
 0x4df   : > { %v1486_v30 = vcombine.high %v1460_v23, %v1468_v25  ;;  %v1502_v32 = vcombine.high %v1476_v26, %v1484_v27  ;;  %v1485_v6 = vcombine.low %v1460_v23, %v1468_v25  ;;  %v1501_v33 = vcombine.low %v1476_v26, %v1484_v27 }
 0x4e1   : > { %v1500_v34 = vrot.slane %v1486_v30, %v2243_v31  ;;  %v1516_v35 = vrot.slane %v1502_v32, %v2243_v31  ;;  %v1493_v36 = vrot.slane %v1485_v6, %v2243_v31  ;;  %v1509_v37 = vrot.slane %v1501_v33, %v2243_v31  ;;  %v1920_v32 = vld [vmem:[%s2456_s10] ss:$0 sm:$0xff] }
 0x4e3   : > { %v1519_v28 = vcombine.low %v1500_v34, %v1516_v35  ;;  %v1518_v29 = vcombine.high %v1493_v36, %v1509_v37  ;;  %v1517_v40 = vcombine.low %v1493_v36, %v1509_v37  ;;  %v1520_v24 = vcombine.high %v1500_v34, %v1516_v35 }
 0x4e5   : > { %1526 = vrot.lane.b32.xlu1 %v1519_v28, %s2113_s15  ;;  %1522 = vrot.lane.b32.xlu0 %v1518_v29, %s2114_s16 }
 0x4e9   : > { %1530 = vrot.lane.b32.xlu0 %v1520_v24, %s2115_s17 }
 0x557   : > { %v1523_v11 = vpop.permute.xlu0 %1522  ;;  %v1527_v10 = vpop.permute.xlu1 %1526 }
 0x558   : > { %v1533_v12 = vsel %vm967_vm2, %v1517_v40, %v1523_v11 }
 0x559   : > { %v1535_v42 = vsel %vm1534_vm4, %v1533_v12, %v1527_v10 }
 0x55b   : > { %v1531_v41 = vpop.permute.xlu0 %1530 }
 0x55c   : > { %v1537_v43 = vsel %vm1536_vm5, %v1535_v42, %v1531_v41 }
 0x55d   : > { %v1538_v31 = vpack.c.bf16 %v1537_v43, %v1537_v43 }
 0x55f   : > { %2021 = vmatmul.mubr.msk.bf16.vlgmr.msra.gmra.mxu1 %vm461_vm1, %v1538_v31  ;;  %v1926_v31 = vld [vmem:[%s2457_s11] ss:$0 sm:$0xff] }
 0x560   : > { %2040 = vmatprep.mubr.msk.bf16.mxu1 %vm2105_vm0, %v2104_v1  ;;  %2033 = vmatpush3.bf16.msra.mxu1 %v2070_v5 }
 0x561   : > { %2034 = vmatprep.subr.bf16.mxu1 %v2104_v1 }
 0x564   : > { %2035 = vmatpush3.bf16.msra.mxu1 %v2071_v7 }
 0x565   : > { %2036 = vmatprep.subr.bf16.mxu1 %v2104_v1 }
 0x568   : > { %2037 = vmatpush3.bf16.msra.mxu1 %v2072_v8 }
 0x569   : > { %2038 = vmatprep.subr.bf16.mxu1 %v2104_v1 }
 0x56c   : > { %2039 = vmatpush3.bf16.msra.mxu1 %v2073_v9 }
 0x61f   : > { %v1599_v38 = vpop.f32.mrf.mxu1 }
 0x620   : > { %v1600_v39 = vadd.f32 %v1910_v44, %v1599_v38 }
 0x621   : > { %v2022_v46 = vpop.f32.mrf.mxu1 }
 0x622   : > { %v1606_v47 = vadd.f32 %v1605_v45, %v1600_v39  ;;  %v1927_v45 = vld [vmem:[%s2458_s12] ss:$0 sm:$0xff] }
 0x623   : > { %v1602_v48 = vpop.f32.mrf.mxu1 }
 0x624   : > { %v1609_v49 = vsel %vm461_vm1, %v1606_v47, 0.0 }
 0x625   : > { %1610 = vadd.xlane.f32.xlu1 %v1609_v49  ;;  %v2023_v50 = vpop.f32.mrf.mxu1 }
 0x6ae   : > { %v1611_v51 = vpop.xlane.xlu1 %1610 }
 0x6af   : > { %v1613_v52 = vmul.f32 0.03125, %v1611_v51 }
 0x6b1   : > { %v1614_v53 = vsub.f32 %v1606_v47, %v1613_v52 }
 0x6b3   : > { %v1615_v54 = vmul.f32 %v1614_v53, %v1614_v53 }
 0x6b5   : > { %v1616_v55 = vsel %vm461_vm1, %v1615_v54, 0.0 }
 0x6b6   : > { %1617 = vadd.xlane.f32.xlu0 %v1616_v55 }
 0x73f   : > { %v1618_v57 = vpop.xlane.xlu0 %1617 }
 0x740   : > { %v1619_v58 = vmul.f32 0.03125, %v1618_v57 }
 0x742   : > { %v1620_v59 = vadd.f32 1e-12, %v1619_v58 }
 0x744   : > { %2090 = vrsqrt.f32 %v1620_v59 }
 0x751   : > { %v2091_v60 = vpop.eup %2090 }
 0x752   : > { %v1622_v62 = vmul.f32 %v2091_v60, %v1614_v53 }
 0x754   : > { %v1629_v0 = vmul.f32 %v1914_v61, %v1622_v62 }
 0x756   : > { %v1636_v2 = vadd.f32 %v1915_v63, %v1629_v0 }
 0x758   : > { %v1637_v4 = vpack.c.bf16 %v1636_v2, %v1636_v2 }
 0x75a   : > { %2029 = vmatmul.mubr.msk.bf16.vlgmr.msra.gmra.mxu0 %vm461_vm1, %v1637_v4 }
 0x81a   : > { %v1698_v14 = vpop.f32.mrf.mxu0 }
 0x81b   : > { %v1699_v15 = vadd.f32 %v1916_v13, %v1698_v14 }
 0x81c   : > { %v2030_v16 = vpop.f32.mrf.mxu0 }
 0x81d   : > { %v1704_v17 = vmul.f32 %v1699_v15, %v1699_v15 }
 0x81e   : > { %v1701_v18 = vpop.f32.mrf.mxu0 }
 0x81f   : > { %v1705_v19 = vmul.f32 %v1704_v17, %v1699_v15 }
 0x820   : > { %v2031_v20 = vpop.f32.mrf.mxu0 }
 0x821   : > { %v1706_v21 = vmul.f32 0.044715, %v1705_v19 }
 0x823   : > { %v1707_v22 = vadd.f32 %v1706_v21, %v1699_v15 }
 0x825   : > { %v1708_v23 = vmul.f32 0.7978846, %v1707_v22 }
 0x827   : > { %2092 = vtanh.f32 %v1708_v23 }
 0x834   : > { %v2093_v1 = vpop.eup %2092 }
 0x835   : > { %v1710_v25 = vadd.f32 1.0, %v2093_v1 }
 0x837   : > { %v1711_v26 = vmul.f32 0.5, %v1710_v25 }
 0x839   : > { %v1712_v27 = vmul.f32 %v1711_v26, %v1699_v15 }
 0x83b   : > { %v1713_v30 = vpack.c.bf16 %v1712_v27, %v1712_v27 }
 0x83d   : > { %2041 = vmatmul.mubr.msk.bf16.vlgmr.msra.gmra.mxu1 %vm1753_vm6, %v1713_v30 }
 0x8fd   : > { %v1791_v6 = vpop.f32.mrf.mxu1 }
 0x8fe   : > { %v1792_v33 = vadd.f32 %v1920_v32, %v1791_v6 }
 0x8ff   : > { %v2042_v34 = vpop.f32.mrf.mxu1 }
 0x900   : > { %v1797_v35 = vadd.f32 %v1792_v33, %v1636_v2 }
 0x901   : > { %v1794_v36 = vpop.f32.mrf.mxu1 }
 0x902   : > { %v1800_v37 = vsel %vm461_vm1, %v1797_v35, 0.0 }
 0x903   : > { %1801 = vadd.xlane.f32.xlu0 %v1800_v37  ;;  %v2043_v28 = vpop.f32.mrf.mxu1 }
 0x98c   : > { %v1802_v29 = vpop.xlane.xlu0 %1801 }
 0x98d   : > { %v1803_v40 = vmul.f32 0.03125, %v1802_v29 }
 0x98f   : > { %v1804_v24 = vsub.f32 %v1797_v35, %v1803_v40 }
 0x991   : > { %v1805_v11 = vmul.f32 %v1804_v24, %v1804_v24 }
 0x993   : > { %v1806_v10 = vsel %vm461_vm1, %v1805_v11, 0.0 }
 0x994   : > { %1807 = vadd.xlane.f32.xlu1 %v1806_v10 }
 0xa1d   : > { %v1808_v12 = vpop.xlane.xlu1 %1807 }
 0xa1e   : > { %v1809_v41 = vmul.f32 0.03125, %v1808_v12 }
 0xa20   : > { %v1810_v42 = vadd.f32 1e-12, %v1809_v41 }
 0xa22   : > { %2094 = vrsqrt.f32 %v1810_v42 }
 0xa2f   : > { %v2095_v43 = vpop.eup %2094 }
 0xa30   : > { %v1812_v44 = vmul.f32 %v2095_v43, %v1804_v24 }
 0xa32   : > { %v1819_v38 = vmul.f32 %v1926_v31, %v1812_v44 }
 0xa34   : > { %v1826_v39 = vadd.f32 %v1927_v45, %v1819_v38 }
 0xa36   : > { %v1827_v46 = vpack.c.bf16 %v1826_v39, %v1826_v39 }
 0xa38   : > { %1829 = vst.msk [vmem:[%s435_s18] sm:$0xf] %vm1828_vm7, %v1827_v46 }
 0xa39 PF: > { %s23_s25 = sadd.s32 1, %s2102_s25  }
 0xa3a   : > { %p20_p4 = scmp.ge.s32.totalorder %s23_s25, 4  }
 0xa3c   :  { %22 = sbr.rel (!%p20_p4) target bundleno = 1 (0x1), region = 102 }

</bundles_post_ra>
